<compile_context>
chip_gen: v5e
topology: v5e:2x2
jax: 0.10.0
libtpu: 0.0.40
codegen_flags: <defaults>
</compile_context>

<pallas_src>
import functools

import jax
import jax.numpy as jnp
from jax import lax
from jax.experimental import pallas as pl
from jax.experimental.pallas import tpu as pltpu


def _fused_bn_add_relu_conv_kernel(x_ref, r_ref, gamma_ref, beta_ref, w_ref,
                                   o_ref, *, eps, inv_count):
    # x_ref/r_ref: (N, Cin, HW) f32 resident blocks.
    # gamma_ref/beta_ref: (1, Cin, 1) f32.  w_ref: (Cout, Cin) bf16.
    # o_ref: (N, Cout, HW) f32.
    x = x_ref[...].astype(jnp.float32)                       # (N, Cin, HW)
    r = r_ref[...].astype(jnp.float32)

    # --- Batch statistics over (N, HW), two-pass for numerical robustness ---
    # Lane (spatial) reduce first (XLU), then the tiny batch-axis reduce.
    s = jnp.sum(x, axis=2, keepdims=True)                    # (N, Cin, 1)
    mean = jnp.sum(s, axis=0, keepdims=True) * inv_count     # (1, Cin, 1)
    centered = x - mean
    sq = jnp.sum(centered * centered, axis=2, keepdims=True)
    var = jnp.sum(sq, axis=0, keepdims=True) * inv_count     # (1, Cin, 1)
    inv_std = lax.rsqrt(var + eps)

    # --- Affine + residual add + ReLU ---
    scale = gamma_ref[...] * inv_std                         # (1, Cin, 1)
    y = jnp.maximum(centered * scale + beta_ref[...] + r, 0.0)

    # --- 1x1 conv == (Cout, Cin) @ (Cin, HW) on the MXU, bf16 in / f32 acc ---
    y_bf = y.astype(jnp.bfloat16)
    w = w_ref[...]                                           # (Cout, Cin) bf16
    for n in range(y.shape[0]):                              # static, small N
        o_ref[n] = jnp.dot(w, y_bf[n],
                           preferred_element_type=jnp.float32).astype(o_ref.dtype)


def fused_bn_add_relu_conv1x1(x187, x180, gamma, beta, conv_w, *, eps=1e-5):
    """x187, x180: (N, Cin, H, W) NCHW.  conv_w: (Cout, Cin, 1, 1).  NCHW out."""
    N, Cin, H, W = x187.shape
    Cout = conv_w.shape[0]
    HW = H * W

    # Free reshapes only -- no transposes, no extra HBM traffic.
    x = x187.reshape(N, Cin, HW)
    r = x180.reshape(N, Cin, HW)
    g = gamma.reshape(1, Cin, 1).astype(jnp.float32)
    b = beta.reshape(1, Cin, 1).astype(jnp.float32)
    w = conv_w.reshape(Cout, Cin).astype(jnp.bfloat16)       # bf16 weight DMA

    inv_count = 1.0 / float(N * HW)
    kernel = functools.partial(_fused_bn_add_relu_conv_kernel,
                               eps=eps, inv_count=inv_count)

    out = pl.pallas_call(
        kernel,
        out_shape=jax.ShapeDtypeStruct((N, Cout, HW), jnp.float32),
        grid=(1,),
        in_specs=[
            pl.BlockSpec((N, Cin, HW), lambda i: (0, 0, 0)),   # x  (resident)
            pl.BlockSpec((N, Cin, HW), lambda i: (0, 0, 0)),   # r  (resident)
            pl.BlockSpec((1, Cin, 1), lambda i: (0, 0, 0)),    # gamma
            pl.BlockSpec((1, Cin, 1), lambda i: (0, 0, 0)),    # beta
            pl.BlockSpec((Cout, Cin), lambda i: (0, 0)),       # weight (bf16)
        ],
        out_specs=pl.BlockSpec((N, Cout, HW), lambda i: (0, 0, 0)),
        compiler_params=pltpu.CompilerParams(
            dimension_semantics=("arbitrary",)),
    )(x, r, g, b, w)

    return out.reshape(N, Cout, H, W)


def _reference(x187, x180, gamma, beta, conv_w, eps=1e-5):
    # Pure-JAX reference of the PyTorch forward (training-mode BN).
    x = x187.astype(jnp.float32)
    mean = jnp.mean(x, axis=(0, 2, 3), keepdims=True)
    var = jnp.mean((x - mean) ** 2, axis=(0, 2, 3), keepdims=True)
    xhat = (x - mean) / jnp.sqrt(var + eps)
    y = xhat * gamma.reshape(1, -1, 1, 1) + beta.reshape(1, -1, 1, 1)
    y = jnp.maximum(y + x180, 0.0)
    w = conv_w.reshape(conv_w.shape[0], conv_w.shape[1])     # (Cout, Cin)
    return jnp.einsum("nchw,oc->nohw", y, w)


if __name__ == "__main__":
    # Small shapes consistent with the module (original: N=1, Cin=1024,
    # Cout=512, H=W=14).  H=W=14 keeps the non-multiple-of-128 spatial extent
    # (full-dim block) path covered.
    N, Cin, Cout, H, W = 2, 128, 64, 14, 14

    key = jax.random.PRNGKey(0)
    k1, k2, k3, k4, k5 = jax.random.split(key, 5)
    x187 = jax.random.normal(k1, (N, Cin, H, W), dtype=jnp.float32)
    x180 = jax.random.normal(k2, (N, Cin, H, W), dtype=jnp.float32)
    gamma = jax.random.normal(k3, (Cin,), dtype=jnp.float32) * 0.1 + 1.0
    beta = jax.random.normal(k4, (Cin,), dtype=jnp.float32) * 0.1
    conv_w = jax.random.normal(k5, (Cout, Cin, 1, 1), dtype=jnp.float32) * 0.05

    out = fused_bn_add_relu_conv1x1(x187, x180, gamma, beta, conv_w)
    out = jax.block_until_ready(out)

    ref = _reference(x187, x180, gamma, beta, conv_w)
    assert out.shape == (N, Cout, H, W)
    max_err = jnp.max(jnp.abs(out - ref))
    # bf16 MXU path loosens accuracy slightly vs the f32 reference.
    assert jnp.allclose(out, ref, atol=2e-2, rtol=2e-2), f"max abs err {max_err}"

    print("KERNEL_OK")
</pallas_src>

<mosaic_0001>
module attributes {stable_mosaic.version = 11 : i64} {
  func.func @_fused_bn_add_relu_conv_kernel(%arg0: i32, %arg1: memref<2x128x196xf32, #tpu.memory_space<vmem>>, %arg2: memref<2x128x196xf32, #tpu.memory_space<vmem>>, %arg3: memref<1x128x1xf32, #tpu.memory_space<vmem>>, %arg4: memref<1x128x1xf32, #tpu.memory_space<vmem>>, %arg5: memref<64x128xbf16, #tpu.memory_space<vmem>>, %arg6: memref<2x64x196xf32, #tpu.memory_space<vmem>>) attributes {dimension_semantics = [#tpu.dimension_semantics<arbitrary>], iteration_bounds = array<i64: 1>, scalar_prefetch = 0 : i64, scratch_operands = 0 : i64, tpu.core_type = #tpu.core_type<tc>, window_params = [{pipeline_mode = #tpu.pipeline_mode<synchronous>, transform_indices = @transform_0, window_bounds = array<i64: 2, 128, 196>}, {pipeline_mode = #tpu.pipeline_mode<synchronous>, transform_indices = @transform_1, window_bounds = array<i64: 2, 128, 196>}, {pipeline_mode = #tpu.pipeline_mode<synchronous>, transform_indices = @transform_2, window_bounds = array<i64: 1, 128, 1>}, {pipeline_mode = #tpu.pipeline_mode<synchronous>, transform_indices = @transform_3, window_bounds = array<i64: 1, 128, 1>}, {pipeline_mode = #tpu.pipeline_mode<synchronous>, transform_indices = @transform_4, window_bounds = array<i64: 64, 128>}, {pipeline_mode = #tpu.pipeline_mode<synchronous>, transform_indices = @transform_5, window_bounds = array<i64: 2, 64, 196>}]} {
    %c0 = arith.constant 0 : index
    %c0_0 = arith.constant 0 : index
    %c0_1 = arith.constant 0 : index
    %0 = vector.load %arg1[%c0, %c0_0, %c0_1] : memref<2x128x196xf32, #tpu.memory_space<vmem>>, vector<2x128x196xf32>
    %c0_2 = arith.constant 0 : index
    %c0_3 = arith.constant 0 : index
    %c0_4 = arith.constant 0 : index
    %1 = vector.load %arg2[%c0_2, %c0_3, %c0_4] : memref<2x128x196xf32, #tpu.memory_space<vmem>>, vector<2x128x196xf32>
    %cst = arith.constant dense<0.000000e+00> : vector<2x128xf32>
    %2 = vector.multi_reduction <add>, %0, %cst [2] : vector<2x128x196xf32> to vector<2x128xf32>
    %3 = vector.shape_cast %2 : vector<2x128xf32> to vector<2x128x1xf32>
    %cst_5 = arith.constant dense<0.000000e+00> : vector<128x1xf32>
    %4 = vector.multi_reduction <add>, %3, %cst_5 [0] : vector<2x128x1xf32> to vector<128x1xf32>
    %5 = vector.shape_cast %4 : vector<128x1xf32> to vector<1x128x1xf32>
    %cst_6 = arith.constant 0.00255102036 : f32
    %6 = vector.broadcast %cst_6 : f32 to vector<1x128x1xf32>
    %7 = arith.mulf %5, %6 : vector<1x128x1xf32>
    %8 = vector.broadcast %7 : vector<1x128x1xf32> to vector<2x128x196xf32>
    %9 = arith.subf %0, %8 : vector<2x128x196xf32>
    %10 = arith.mulf %9, %9 : vector<2x128x196xf32>
    %cst_7 = arith.constant dense<0.000000e+00> : vector<2x128xf32>
    %11 = vector.multi_reduction <add>, %10, %cst_7 [2] : vector<2x128x196xf32> to vector<2x128xf32>
    %12 = vector.shape_cast %11 : vector<2x128xf32> to vector<2x128x1xf32>
    %cst_8 = arith.constant dense<0.000000e+00> : vector<128x1xf32>
    %13 = vector.multi_reduction <add>, %12, %cst_8 [0] : vector<2x128x1xf32> to vector<128x1xf32>
    %14 = vector.shape_cast %13 : vector<128x1xf32> to vector<1x128x1xf32>
    %cst_9 = arith.constant 0.00255102036 : f32
    %15 = vector.broadcast %cst_9 : f32 to vector<1x128x1xf32>
    %16 = arith.mulf %14, %15 : vector<1x128x1xf32>
    %cst_10 = arith.constant 9.99999974E-6 : f32
    %17 = vector.broadcast %cst_10 : f32 to vector<1x128x1xf32>
    %18 = arith.addf %16, %17 : vector<1x128x1xf32>
    %19 = math.rsqrt %18 : vector<1x128x1xf32>
    %c0_11 = arith.constant 0 : index
    %c0_12 = arith.constant 0 : index
    %c0_13 = arith.constant 0 : index
    %20 = vector.load %arg3[%c0_11, %c0_12, %c0_13] : memref<1x128x1xf32, #tpu.memory_space<vmem>>, vector<1x128x1xf32>
    %21 = arith.mulf %20, %19 : vector<1x128x1xf32>
    %22 = vector.broadcast %21 : vector<1x128x1xf32> to vector<2x128x196xf32>
    %23 = arith.mulf %9, %22 : vector<2x128x196xf32>
    %c0_14 = arith.constant 0 : index
    %c0_15 = arith.constant 0 : index
    %c0_16 = arith.constant 0 : index
    %24 = vector.load %arg4[%c0_14, %c0_15, %c0_16] : memref<1x128x1xf32, #tpu.memory_space<vmem>>, vector<1x128x1xf32>
    %25 = vector.broadcast %24 : vector<1x128x1xf32> to vector<2x128x196xf32>
    %26 = arith.addf %23, %25 : vector<2x128x196xf32>
    %27 = arith.addf %26, %1 : vector<2x128x196xf32>
    %cst_17 = arith.constant 0.000000e+00 : f32
    %28 = vector.broadcast %cst_17 : f32 to vector<2x128x196xf32>
    %29 = arith.maximumf %27, %28 : vector<2x128x196xf32>
    %30 = arith.truncf %29 : vector<2x128x196xf32> to vector<2x128x196xbf16>
    %c0_18 = arith.constant 0 : index
    %c0_19 = arith.constant 0 : index
    %31 = vector.load %arg5[%c0_18, %c0_19] : memref<64x128xbf16, #tpu.memory_space<vmem>>, vector<64x128xbf16>
    %32 = vector.extract_strided_slice %30 {offsets = [0, 0, 0], sizes = [1, 128, 196], strides = [1, 1, 1]} : vector<2x128x196xbf16> to vector<1x128x196xbf16>
    %33 = vector.shape_cast %32 : vector<1x128x196xbf16> to vector<128x196xbf16>
    %cst_20 = arith.constant dense<0.000000e+00> : vector<64x196xf32>
    %34 = tpu.matmul %31, %33, %cst_20 {dimension_numbers = #tpu.dot_dimension_numbers<[1], [0], [0], [1], [0, 0, 1, 1], [], []>} : vector<64x128xbf16>, vector<128x196xbf16>, vector<64x196xf32> -> vector<64x196xf32>
    %c0_21 = arith.constant 0 : index
    %c0_22 = arith.constant 0 : index
    %c0_23 = arith.constant 0 : index
    %35 = vector.load %arg6[%c0_21, %c0_22, %c0_23] : memref<2x64x196xf32, #tpu.memory_space<vmem>>, vector<1x64x196xf32>
    %36 = vector.shape_cast %35 : vector<1x64x196xf32> to vector<64x196xf32>
    %37 = vector.shape_cast %34 : vector<64x196xf32> to vector<1x64x196xf32>
    tpu.vector_store %arg6[%c0_21, %c0_22, %c0_23], %37 {strides = array<i32>} : memref<2x64x196xf32, #tpu.memory_space<vmem>>, vector<1x64x196xf32>,
    %38 = vector.extract_strided_slice %30 {offsets = [1, 0, 0], sizes = [1, 128, 196], strides = [1, 1, 1]} : vector<2x128x196xbf16> to vector<1x128x196xbf16>
    %39 = vector.shape_cast %38 : vector<1x128x196xbf16> to vector<128x196xbf16>
    %cst_24 = arith.constant dense<0.000000e+00> : vector<64x196xf32>
    %40 = tpu.matmul %31, %39, %cst_24 {dimension_numbers = #tpu.dot_dimension_numbers<[1], [0], [0], [1], [0, 0, 1, 1], [], []>} : vector<64x128xbf16>, vector<128x196xbf16>, vector<64x196xf32> -> vector<64x196xf32>
    %c1 = arith.constant 1 : index
    %c0_25 = arith.constant 0 : index
    %c0_26 = arith.constant 0 : index
    %41 = vector.load %arg6[%c1, %c0_25, %c0_26] : memref<2x64x196xf32, #tpu.memory_space<vmem>>, vector<1x64x196xf32>
    %42 = vector.shape_cast %41 : vector<1x64x196xf32> to vector<64x196xf32>
    %43 = vector.shape_cast %40 : vector<64x196xf32> to vector<1x64x196xf32>
    tpu.vector_store %arg6[%c1, %c0_25, %c0_26], %43 {strides = array<i32>} : memref<2x64x196xf32, #tpu.memory_space<vmem>>, vector<1x64x196xf32>,
    return
  }
  func.func @transform_0(%arg0: i32) -> (i32, i32, i32) {
    %c0_i32 = arith.constant 0 : i32
    %c0_i32_0 = arith.constant 0 : i32
    %c0_i32_1 = arith.constant 0 : i32
    %c0_i32_2 = arith.constant 0 : i32
    return %c0_i32, %c0_i32_0, %c0_i32_1 : i32, i32, i32
  }
  func.func @transform_1(%arg0: i32) -> (i32, i32, i32) {
    %c0_i32 = arith.constant 0 : i32
    %c0_i32_0 = arith.constant 0 : i32
    %c0_i32_1 = arith.constant 0 : i32
    %c0_i32_2 = arith.constant 0 : i32
    return %c0_i32, %c0_i32_0, %c0_i32_1 : i32, i32, i32
  }
  func.func @transform_2(%arg0: i32) -> (i32, i32, i32) {
    %c0_i32 = arith.constant 0 : i32
    %c0_i32_0 = arith.constant 0 : i32
    %c0_i32_1 = arith.constant 0 : i32
    %c0_i32_2 = arith.constant 0 : i32
    return %c0_i32, %c0_i32_0, %c0_i32_1 : i32, i32, i32
  }
  func.func @transform_3(%arg0: i32) -> (i32, i32, i32) {
    %c0_i32 = arith.constant 0 : i32
    %c0_i32_0 = arith.constant 0 : i32
    %c0_i32_1 = arith.constant 0 : i32
    %c0_i32_2 = arith.constant 0 : i32
    return %c0_i32, %c0_i32_0, %c0_i32_1 : i32, i32, i32
  }
  func.func @transform_4(%arg0: i32) -> (i32, i32) {
    %c0_i32 = arith.constant 0 : i32
    %c0_i32_0 = arith.constant 0 : i32
    %c0_i32_1 = arith.constant 0 : i32
    return %c0_i32, %c0_i32_0 : i32, i32
  }
  func.func @transform_5(%arg0: i32) -> (i32, i32, i32) {
    %c0_i32 = arith.constant 0 : i32
    %c0_i32_0 = arith.constant 0 : i32
    %c0_i32_1 = arith.constant 0 : i32
    %c0_i32_2 = arith.constant 0 : i32
    return %c0_i32, %c0_i32_0, %c0_i32_1 : i32, i32, i32
  }
}

</mosaic_0001>

<bundles_post_ra>
// kernel: tpu_custom_call.1
= control target key start
LH: loop header
LB: loop body
LE: loop exit
PB: predicated region body
PF: predicated region fallthrough
CT: control target
= control target key end

     0   :  { %vm149_vm0 = vcmask 556032   ;;  %s3069_s0 = inlined_call_operand.vmem [shape: f32[2,128,196], index: 0, kind: input, shape index: {}]   ;;  %s3070_s1 = inlined_call_operand.vmem [shape: f32[2,128,196], index: 1, kind: input, shape index: {}]   ;;  %s3071_s2 = inlined_call_operand.vmem [shape: f32[1,128,1], index: 2, kind: input, shape index: {}]   ;;  %s3072_s3 = inlined_call_operand.vmem [shape: f32[1,128,1], index: 3, kind: input, shape index: {}]   ;;  %s3073_s4 = inlined_call_operand.vmem [shape: bf16[64,128], index: 4, kind: input, shape index: {}]   ;;  %s3074_s5 = inlined_call_operand.hbm [shape: f32[2,64,196], index: 5, kind: output, shape index: {}]  }
   0x1   :  { %v1751_v0 = vld [vmem:[%s3069_s0 + $0x1e0] sm:$0xff]  ;;  %v1756_v1 = vld [vmem:[%s3069_s0 + $0x1e8] sm:$0xff]  ;;  %v1788_v10 = vld [vmem:[%s3069_s0 + $0x1f8] sm:$0xff] }
   0x2   :  { %v1761_v2 = vld [vmem:[%s3069_s0 + $0xe0] sm:$0xff]  ;;  %v270_v3 = vsel %vm149_vm0, %v1756_v1, 0.0  ;;  %v1768_v4 = vld [vmem:[%s3069_s0 + $0xe8] sm:$0xff]  ;;  %v1795_v13 = vld [vmem:[%s3069_s0 + $0xf8] sm:$0xff]  ;;  %v274_v16 = vsel %vm149_vm0, %v1788_v10, 0.0 }
   0x3   :  { %v1773_v5 = vld [vmem:[%s3069_s0 + $0xc0] sm:$0xff]  ;;  %v1778_v6 = vld [vmem:[%s3069_s0 + $0xc8] sm:$0xff]  ;;  %v271_v7 = vadd.f32 %v270_v3, %v1751_v0  ;;  %v206_v8 = vsel %vm149_vm0, %v1768_v4, 0.0  ;;  %v1800_v14 = vld [vmem:[%s3069_s0 + $0xd8] sm:$0xff]  ;;  %v210_v18 = vsel %vm149_vm0, %v1795_v13, 0.0 }
   0x4   :  { %v198_v9 = vsel %vm149_vm0, %v1778_v6, 0.0  ;;  %v207_v11 = vadd.f32 %v206_v8, %v1761_v2  ;;  %v1805_v15 = vld [vmem:[%s3069_s0 + $0x1f0] sm:$0xff]  ;;  %v202_v20 = vsel %vm149_vm0, %v1800_v14, 0.0  ;;  %v1829_v24 = vld [vmem:[%s3069_s0 + $0x1d8] sm:$0xff]  ;;  %v1834_v25 = vld [vmem:[%s3069_s0 + $0x1c8] sm:$0xff] }
   0x5   :  { %v199_v12 = vadd.f32 %v198_v9, %v1773_v5  ;;  %272 = vadd.xlane.f32.xlu1 %v271_v7  ;;  %v1812_v17 = vld [vmem:[%s3069_s0 + $0xf0] sm:$0xff]  ;;  %v275_v21 = vadd.f32 %v274_v16, %v1805_v15  ;;  %v1839_v26 = vld [vmem:[%s3069_s0 + $0xa8] sm:$0xff] }
   0x6   :  { %208 = vadd.xlane.f32.xlu0 %v207_v11  ;;  %v1819_v19 = vld [vmem:[%s3069_s0 + $0xd0] sm:$0xff]  ;;  %v211_v22 = vadd.f32 %v210_v18, %v1812_v17 }
   0x7   :  { %200 = vadd.xlane.f32.xlu2 %v199_v12  ;;  %v203_v23 = vadd.f32 %v202_v20, %v1819_v19 }
   0xd   :  { %276 = vadd.xlane.f32.xlu1 %v275_v21 }
   0xe   :  { %10 = vsyncpa [#allocation3], 0  ;;  %212 = vadd.xlane.f32.xlu0 %v211_v22  ;;  %v1844_v27 = vld [vmem:[%s3069_s0 + $0x1d0] sm:$0xff]  ;;  %v266_v28 = vsel %vm149_vm0, %v1829_v24, 0.0  ;;  %v1851_v29 = vld [vmem:[%s3069_s0 + $0x1c0] sm:$0xff]  ;;  %v262_v30 = vsel %vm149_vm0, %v1834_v25, 0.0 }
   0xf   :  { %204 = vadd.xlane.f32.xlu2 %v203_v23  ;;  %v1858_v31 = vld [vmem:[%s3069_s0 + $0xa0] sm:$0xff]  ;;  %v190_v32 = vsel %vm149_vm0, %v1839_v26, 0.0  ;;  %v267_v33 = vadd.f32 %v266_v28, %v1844_v27  ;;  %v263_v34 = vadd.f32 %v262_v30, %v1851_v29  ;;  %v1868_v36 = vld [vmem:[%s3069_s0 + $0x1a8] sm:$0xff]  ;;  %v1873_v37 = vld [vmem:[%s3069_s0 + $0xb8] sm:$0xff]  ;;  %s1617_s30 = sshll.u32 %s3074_s5, 4  ;;  %s1716_s6 = smov 256   ;;  %s1618_s30 = int_to_ptr.hbm [resolvable:$true] %s1617_s30 }
  0x10   :  { %v191_v35 = vadd.f32 %v190_v32, %v1858_v31  ;;  %v1878_v38 = vld [vmem:[%s3069_s0 + $0x1b8] sm:$0xff]  ;;  %v1883_v39 = vld [vmem:[%s3069_s0 + $0x1a0] sm:$0xff]  ;;  %v254_v40 = vsel %vm149_vm0, %v1868_v36, 0.0  ;;  %v1890_v41 = vld [vmem:[%s3069_s0 + $0xb0] sm:$0xff]  ;;  %v194_v42 = vsel %vm149_vm0, %v1873_v37, 0.0 }
  0x11   :  { %v1897_v43 = vld [vmem:[%s3069_s0 + $0x1b0] sm:$0xff]  ;;  %v258_v44 = vsel %vm149_vm0, %v1878_v38, 0.0  ;;  %v255_v45 = vadd.f32 %v254_v40, %v1883_v39  ;;  %v195_v46 = vadd.f32 %v194_v42, %v1890_v41  ;;  %v1907_v48 = vld [vmem:[%s3069_s0 + $0x98] sm:$0xff]  ;;  %v1912_v49 = vld [vmem:[%s3069_s0 + $0x188] sm:$0xff] }
  0x12   :  { %v259_v47 = vadd.f32 %v258_v44, %v1897_v43  ;;  %v1917_v50 = vld [vmem:[%s3069_s0 + $0x88] sm:$0xff]  ;;  %v1922_v51 = vld [vmem:[%s3069_s0 + $0x90] sm:$0xff]  ;;  %v186_v52 = vsel %vm149_vm0, %v1907_v48, 0.0  ;;  %v1929_v53 = vld [vmem:[%s3069_s0 + $0x180] sm:$0xff]  ;;  %v246_v54 = vsel %vm149_vm0, %v1912_v49, 0.0 }
  0x13   :  { %v1936_v55 = vld [vmem:[%s3069_s0 + $0x80] sm:$0xff]  ;;  %v182_v56 = vsel %vm149_vm0, %v1917_v50, 0.0  ;;  %v187_v57 = vadd.f32 %v186_v52, %v1922_v51  ;;  %v247_v58 = vadd.f32 %v246_v54, %v1929_v53  ;;  %v1946_v60 = vld [vmem:[%s3069_s0 + $0x68] sm:$0xff]  ;;  %v1951_v61 = vld [vmem:[%s3069_s0 + $0x198] sm:$0xff] }
  0x14   :  { %v183_v59 = vadd.f32 %v182_v56, %v1936_v55  ;;  %v1956_v62 = vld [vmem:[%s3069_s0 + $0x78] sm:$0xff]  ;;  %v1961_v63 = vld [vmem:[%s3069_s0 + $0x60] sm:$0xff]  ;;  %v174_v3 = vsel %vm149_vm0, %v1946_v60, 0.0  ;;  %v1968_v7 = vld [vmem:[%s3069_s0 + $0x190] sm:$0xff]  ;;  %v250_v8 = vsel %vm149_vm0, %v1951_v61, 0.0 }
  0x15   :  { %268 = vadd.xlane.f32.xlu1 %v267_v33  ;;  %v1975_v9 = vld [vmem:[%s3069_s0 + $0x70] sm:$0xff]  ;;  %v178_v11 = vsel %vm149_vm0, %v1956_v62, 0.0  ;;  %v175_v12 = vadd.f32 %v174_v3, %v1961_v63  ;;  %v251_v16 = vadd.f32 %v250_v8, %v1968_v7  ;;  %v1985_v20 = vld [vmem:[%s3069_s0 + $0x178] sm:$0xff]  ;;  %v1990_v21 = vld [vmem:[%s3069_s0 + $0x168] sm:$0xff] }
  0x16   :  { %264 = vadd.xlane.f32.xlu0 %v263_v34  ;;  %v179_v18 = vadd.f32 %v178_v11, %v1975_v9  ;;  %v1995_v22 = vld [vmem:[%s3069_s0 + $0x48] sm:$0xff]  ;;  %v2000_v23 = vld [vmem:[%s3069_s0 + $0x170] sm:$0xff]  ;;  %v242_v28 = vsel %vm149_vm0, %v1985_v20, 0.0  ;;  %v2007_v30 = vld [vmem:[%s3069_s0 + $0x160] sm:$0xff]  ;;  %v238_v32 = vsel %vm149_vm0, %v1990_v21, 0.0 }
  0x17   :  { %192 = vadd.xlane.f32.xlu2 %v191_v35  ;;  %v2014_v33 = vld [vmem:[%s3069_s0 + $0x40] sm:$0xff]  ;;  %v166_v34 = vsel %vm149_vm0, %v1995_v22, 0.0  ;;  %v243_v35 = vadd.f32 %v242_v28, %v2000_v23  ;;  %v239_v40 = vadd.f32 %v238_v32, %v2007_v30  ;;  %v2024_v44 = vld [vmem:[%s3069_s0 + $0x148] sm:$0xff]  ;;  %v2046_v54 = vld [vmem:[%s3069_s0 + $0x50] sm:$0xff] }
  0x18   :  { %v167_v42 = vadd.f32 %v166_v34, %v2014_v33  ;;  %v230_v52 = vsel %vm149_vm0, %v2024_v44, 0.0  ;;  %v2063_v11 = vld [vmem:[%s3069_s0 + $0x38] sm:$0xff]  ;;  %v2085_v32 = vld [vmem:[%s3069_s0 + $0x120] sm:$0xff] }
  0x19   :  { %3130 = vst [vmem:[#allocation5_spill] sm:$0xff] %v2063_v11  ;;  %v162_v28 = vsel %vm149_vm0, %v2063_v11, 0.0 }
  0x1a   :  { %3134 = vst [vmem:[#allocation9_spill] sm:$0xff] %v2085_v32 }
  0x1d   :  { %256 = vadd.xlane.f32.xlu1 %v255_v45  ;;  %v2029_v45 = vld [vmem:[%s3069_s0 + $0x58] sm:$0xff] }
  0x1e   :  { %196 = vadd.xlane.f32.xlu0 %v195_v46  ;;  %v2034_v46 = vld [vmem:[%s3069_s0 + $0x158] sm:$0xff]  ;;  %v170_v56 = vsel %vm149_vm0, %v2029_v45, 0.0 }
  0x1f   :  { %260 = vadd.xlane.f32.xlu2 %v259_v47  ;;  %v2039_v47 = vld [vmem:[%s3069_s0 + $0x140] sm:$0xff]  ;;  %v171_v3 = vadd.f32 %v170_v56, %v2046_v54 }
  0x25   :  { %188 = vadd.xlane.f32.xlu1 %v187_v57  ;;  %v2053_v57 = vld [vmem:[%s3069_s0 + $0x150] sm:$0xff] }
  0x26   :  { %184 = vadd.xlane.f32.xlu0 %v183_v59  ;;  %v231_v59 = vadd.f32 %v230_v52, %v2039_v47 }
  0x27   :  { %248 = vadd.xlane.f32.xlu2 %v247_v58  ;;  %v234_v58 = vsel %vm149_vm0, %v2034_v46, 0.0 }
  0x28   :  { %v235_v8 = vadd.f32 %v234_v58, %v2053_v57  ;;  %v2102_v58 = vld [vmem:[%s3069_s0 + $0x8] sm:$0xff] }
  0x29   :  { %3135 = vst [vmem:[#allocation10_spill] sm:$0xff] %v2102_v58 }
  0x2d   :  { %176 = vadd.xlane.f32.xlu1 %v175_v12  ;;  %v2068_v12 = vld [vmem:[%s3069_s0 + $0x128] sm:$0xff] }
  0x2e   :  { %252 = vadd.xlane.f32.xlu0 %v251_v16  ;;  %3131 = vst [vmem:[#allocation6_spill] sm:$0xff] %v2068_v12  ;;  %v2073_v16 = vld [vmem:[%s3069_s0 + $0x28] sm:$0xff]  ;;  %v222_v34 = vsel %vm149_vm0, %v2068_v12, 0.0 }
  0x2f   :  { %180 = vadd.xlane.f32.xlu2 %v179_v18  ;;  %3132 = vst [vmem:[#allocation7_spill] sm:$0xff] %v2073_v16  ;;  %v2078_v18 = vld [vmem:[%s3069_s0 + $0x30] sm:$0xff]  ;;  %v223_v52 = vadd.f32 %v222_v34, %v2085_v32 }
  0x30   :  { %3133 = vst [vmem:[#allocation8_spill] sm:$0xff] %v2078_v18  ;;  %v2124_v34 = vld [vmem:[%s3069_s0 + $0x130] sm:$0xff] }
  0x31   :  { %3139 = vst [vmem:[#allocation14_spill] sm:$0xff] %v2124_v34 }
  0x35   :  { %244 = vadd.xlane.f32.xlu1 %v243_v35  ;;  %v2092_v35 = vld [vmem:[%s3069_s0 + $0x20] sm:$0xff] }
  0x36   :  { %240 = vadd.xlane.f32.xlu0 %v239_v40  ;;  %v158_v40 = vsel %vm149_vm0, %v2073_v16, 0.0 }
  0x37   :  { %168 = vadd.xlane.f32.xlu2 %v167_v42  ;;  %v163_v42 = vadd.f32 %v162_v28, %v2078_v18  ;;  %v159_v56 = vadd.f32 %v158_v40, %v2092_v35  ;;  %v150_v28 = vsel %vm149_vm0, %v2102_v58, 0.0  ;;  %v2141_v18 = vld [vmem:[%s3069_s0 + $0x118] sm:$0xff] }
  0x38   :  { %3141 = vst [vmem:[#allocation16_spill] sm:$0xff] %v2141_v18 }
  0x3d   :  { %232 = vadd.xlane.f32.xlu1 %v231_v59  ;;  %v2107_v59 = vld [vmem:[%s3069_s0 + $0x138] sm:$0xff] }
  0x3e   :  { %172 = vadd.xlane.f32.xlu0 %v171_v3  ;;  %3136 = vst [vmem:[#allocation11_spill] sm:$0xff] %v2107_v59  ;;  %v2112_v3 = vld [vmem:[%s3069_s0 + $0x18] sm:$0xff]  ;;  %v226_v40 = vsel %vm149_vm0, %v2107_v59, 0.0  ;;  %v2146_v59 = vld [vmem:[%s3069_s0 + $0x108] sm:$0xff] }
  0x3f   :  { %236 = vadd.xlane.f32.xlu2 %v235_v8  ;;  %3137 = vst [vmem:[#allocation12_spill] sm:$0xff] %v2112_v3  ;;  %v2117_v8 = vld [vmem:[%s3069_s0] sm:$0xff]  ;;  %v227_v58 = vadd.f32 %v226_v40, %v2124_v34  ;;  %v218_v40 = vsel %vm149_vm0, %v2141_v18, 0.0 }
  0x40   :  { %3138 = vst [vmem:[#allocation13_spill] sm:$0xff] %v2117_v8 }
  0x41   :  { %3142 = vst [vmem:[#allocation17_spill] sm:$0xff] %v2146_v59 }
  0x45   :  { %164 = vadd.xlane.f32.xlu1 %v163_v42  ;;  %v2131_v42 = vld [vmem:[%s3069_s0 + $0x10] sm:$0xff] }
  0x46   :  { %160 = vadd.xlane.f32.xlu0 %v159_v56  ;;  %3140 = vst [vmem:[#allocation15_spill] sm:$0xff] %v2131_v42  ;;  %v151_v56 = vadd.f32 %v150_v28, %v2117_v8  ;;  %v2151_v28 = vld [vmem:[%s3069_s0 + $0x110] sm:$0xff]  ;;  %v214_v8 = vsel %vm149_vm0, %v2146_v59, 0.0 }
  0x47   :  { %224 = vadd.xlane.f32.xlu2 %v223_v52  ;;  %v154_v52 = vsel %vm149_vm0, %v2112_v3, 0.0  ;;  %3143 = vst [vmem:[#allocation18_spill] sm:$0xff] %v2151_v28 }
  0x48   :  { %v155_v11 = vadd.f32 %v154_v52, %v2131_v42  ;;  %v2158_v52 = vld [vmem:[%s3069_s0 + $0x100] sm:$0xff] }
  0x4d   :  { %152 = vadd.xlane.f32.xlu1 %v151_v56  ;;  %v219_v56 = vadd.f32 %v218_v40, %v2151_v28 }
  0x4e   :  { %228 = vadd.xlane.f32.xlu0 %v227_v58 }
  0x4f   :  { %156 = vadd.xlane.f32.xlu2 %v155_v11  ;;  %v215_v11 = vadd.f32 %v214_v8, %v2158_v52 }
  0x55   :  { %220 = vadd.xlane.f32.xlu1 %v219_v56 }
  0x56   :  { %216 = vadd.xlane.f32.xlu0 %v215_v11 }
  0x78   :  { %v273_v58 = vpop.xlane.xlu1 %272 }
  0x79   :  { %v209_v3 = vpop.xlane.xlu0 %208 }
  0x7a   :  { %v201_v42 = vpop.xlane.xlu2 %200  ;;  %v292_v34 = vadd.f32 %v273_v58, %v209_v3 }
  0x7c   :  { %v308_v32 = vmul.f32 0.0025510204, %v292_v34 }
  0x7e   :  { %v2165_v18 = vsub.f32 %v1761_v2, %v308_v32  ;;  %v2168_v12 = vsub.f32 %v1768_v4, %v308_v32  ;;  %v2171_v16 = vsub.f32 %v1751_v0, %v308_v32  ;;  %v2174_v40 = vsub.f32 %v1756_v1, %v308_v32 }
  0x80   :  { %3144 = vst [vmem:[#allocation19_spill] sm:$0xff] %v2165_v18  ;;  %v277_v8 = vpop.xlane.xlu1 %276  ;;  %v402_v56 = vmul.f32 %v2165_v18, %v2165_v18  ;;  %v403_v3 = vmul.f32 %v2168_v12, %v2168_v12  ;;  %v434_v2 = vmul.f32 %v2171_v16, %v2171_v16  ;;  %v435_v4 = vmul.f32 %v2174_v40, %v2174_v40 }
  0x81   :  { %3145 = vst [vmem:[#allocation20_spill] sm:$0xff] %v2168_v12  ;;  %v213_v34 = vpop.xlane.xlu0 %212 }
  0x82   :  { %3146 = vst [vmem:[#allocation21_spill] sm:$0xff] %v2171_v16  ;;  %v205_v11 = vpop.xlane.xlu2 %204  ;;  %v293_v0 = vadd.f32 %v277_v8, %v213_v34  ;;  %v494_v58 = vsel %vm149_vm0, %v403_v3, 0.0  ;;  %v558_v1 = vsel %vm149_vm0, %v435_v4, 0.0 }
  0x83   :  { %3147 = vst [vmem:[#allocation22_spill] sm:$0xff] %v2174_v40  ;;  %v495_v32 = vadd.f32 %v494_v58, %v402_v56  ;;  %v559_v28 = vadd.f32 %v558_v1, %v434_v2 }
  0x84   :  { %v309_v59 = vmul.f32 0.0025510204, %v293_v0 }
  0x85   :  { %496 = vadd.xlane.f32.xlu2 %v495_v32  ;;  %560 = vadd.xlane.f32.xlu1 %v559_v28 }
  0x86   :  { %v2187_v12 = vsub.f32 %v1812_v17, %v309_v59  ;;  %v2190_v16 = vsub.f32 %v1795_v13, %v309_v59  ;;  %v2193_v40 = vsub.f32 %v1805_v15, %v309_v59  ;;  %v2196_v8 = vsub.f32 %v1788_v10, %v309_v59 }
  0x88   :  { %3148 = vst [vmem:[#allocation23_spill] sm:$0xff] %v2193_v40  ;;  %v269_v3 = vpop.xlane.xlu1 %268  ;;  %v404_v56 = vmul.f32 %v2187_v12, %v2187_v12  ;;  %v405_v2 = vmul.f32 %v2190_v16, %v2190_v16  ;;  %v436_v17 = vmul.f32 %v2193_v40, %v2193_v40  ;;  %v437_v13 = vmul.f32 %v2196_v8, %v2196_v8 }
  0x89   :  { %v291_v28 = vadd.f32 %v269_v3, %v205_v11  ;;  %v265_v4 = vpop.xlane.xlu0 %264 }
  0x8a   :  { %v193_v15 = vpop.xlane.xlu2 %192  ;;  %v290_v34 = vadd.f32 %v265_v4, %v201_v42  ;;  %v498_v10 = vsel %vm149_vm0, %v405_v2, 0.0  ;;  %v562_v59 = vsel %vm149_vm0, %v437_v13, 0.0 }
  0x8b   :  { %v307_v0 = vmul.f32 0.0025510204, %v291_v28  ;;  %v499_v58 = vadd.f32 %v498_v10, %v404_v56  ;;  %v563_v1 = vadd.f32 %v562_v59, %v436_v17 }
  0x8c   :  { %v306_v32 = vmul.f32 0.0025510204, %v290_v34 }
  0x8d   :  { %500 = vadd.xlane.f32.xlu0 %v499_v58  ;;  %564 = vadd.xlane.f32.xlu2 %v563_v1  ;;  %v2209_v18 = vsub.f32 %v1819_v19, %v307_v0  ;;  %v2212_v40 = vsub.f32 %v1800_v14, %v307_v0  ;;  %v2231_v14 = vsub.f32 %v1829_v24, %v307_v0 }
  0x8e   :  { %v2215_v11 = vsub.f32 %v1773_v5, %v306_v32  ;;  %v2218_v42 = vsub.f32 %v1778_v6, %v306_v32  ;;  %v2221_v3 = vsub.f32 %v1851_v29, %v306_v32  ;;  %v2224_v56 = vsub.f32 %v1834_v25, %v306_v32 }
  0x8f   :  { %v400_v2 = vmul.f32 %v2209_v18, %v2209_v18  ;;  %v401_v19 = vmul.f32 %v2212_v40, %v2212_v40  ;;  %v2243_v24 = vsub.f32 %v1844_v27, %v307_v0  ;;  %v433_v10 = vmul.f32 %v2231_v14, %v2231_v14 }
  0x90   :  { %3149 = vst [vmem:[#allocation24_spill] sm:$0xff] %v2218_v42  ;;  %v257_v5 = vpop.xlane.xlu1 %256  ;;  %v398_v6 = vmul.f32 %v2215_v11, %v2215_v11  ;;  %v399_v29 = vmul.f32 %v2218_v42, %v2218_v42  ;;  %v430_v25 = vmul.f32 %v2221_v3, %v2221_v3  ;;  %v431_v17 = vmul.f32 %v2224_v56, %v2224_v56 }
  0x91   :  { %3150 = vst [vmem:[#allocation25_spill] sm:$0xff] %v2221_v3  ;;  %v288_v13 = vadd.f32 %v257_v5, %v193_v15  ;;  %v197_v28 = vpop.xlane.xlu0 %196  ;;  %v490_v34 = vsel %vm149_vm0, %v401_v19, 0.0  ;;  %v432_v27 = vmul.f32 %v2243_v24, %v2243_v24  ;;  %v554_v5 = vsel %vm149_vm0, %v433_v10, 0.0 }
  0x92   :  { %3151 = vst [vmem:[#allocation26_spill] sm:$0xff] %v2224_v56  ;;  %v261_v4 = vpop.xlane.xlu2 %260  ;;  %v486_v58 = vsel %vm149_vm0, %v399_v29, 0.0  ;;  %v550_v1 = vsel %vm149_vm0, %v431_v17, 0.0  ;;  %v491_v32 = vadd.f32 %v490_v34, %v400_v2 }
  0x93   :  { %v289_v59 = vadd.f32 %v261_v4, %v197_v28  ;;  %v304_v3 = vmul.f32 0.0025510204, %v288_v13  ;;  %v487_v42 = vadd.f32 %v486_v58, %v398_v6  ;;  %v551_v56 = vadd.f32 %v550_v1, %v430_v25 }
  0x94   :  { %492 = vadd.xlane.f32.xlu1 %v491_v32 }
  0x95   :  { %v305_v15 = vmul.f32 0.0025510204, %v289_v59  ;;  %488 = vadd.xlane.f32.xlu0 %v487_v42  ;;  %552 = vadd.xlane.f32.xlu2 %v551_v56  ;;  %v2252_v0 = vsub.f32 %v1858_v31, %v304_v3  ;;  %v2255_v19 = vsub.f32 %v1839_v26, %v304_v3  ;;  %v2265_v42 = vsub.f32 %v1868_v36, %v304_v3 }
  0x96   :  { %v555_v36 = vadd.f32 %v554_v5, %v432_v27  ;;  %v2280_v28 = vsub.f32 %v1883_v39, %v304_v3 }
  0x97   :  { %v2259_v2 = vsub.f32 %v1890_v41, %v305_v15  ;;  %v2262_v6 = vsub.f32 %v1873_v37, %v305_v15  ;;  %v394_v56 = vmul.f32 %v2252_v0, %v2252_v0  ;;  %v395_v31 = vmul.f32 %v2255_v19, %v2255_v19 }
  0x98   :  { %v2272_v26 = vsub.f32 %v1878_v38, %v305_v15  ;;  %v189_v29 = vpop.xlane.xlu1 %188  ;;  %v2283_v4 = vsub.f32 %v1897_v43, %v305_v15  ;;  %v427_v59 = vmul.f32 %v2265_v42, %v2265_v42  ;;  %v426_v39 = vmul.f32 %v2280_v28, %v2280_v28 }
  0x99   :  { %v396_v41 = vmul.f32 %v2259_v2, %v2259_v2  ;;  %v397_v37 = vmul.f32 %v2262_v6, %v2262_v6  ;;  %v185_v17 = vpop.xlane.xlu0 %184  ;;  %v478_v13 = vsel %vm149_vm0, %v395_v31, 0.0 }
  0x9a   :  { %v249_v25 = vpop.xlane.xlu2 %248  ;;  %v479_v10 = vadd.f32 %v478_v13, %v394_v56  ;;  %v429_v1 = vmul.f32 %v2272_v26, %v2272_v26  ;;  %v542_v43 = vsel %vm149_vm0, %v427_v59, 0.0  ;;  %v428_v27 = vmul.f32 %v2283_v4, %v2283_v4 }
  0x9b   :  { %v286_v38 = vadd.f32 %v249_v25, %v185_v17  ;;  %v482_v34 = vsel %vm149_vm0, %v397_v37, 0.0  ;;  %v543_v17 = vadd.f32 %v542_v43, %v426_v39 }
  0x9c   :  { %v483_v58 = vadd.f32 %v482_v34, %v396_v41  ;;  %480 = vadd.xlane.f32.xlu1 %v479_v10  ;;  %v546_v5 = vsel %vm149_vm0, %v429_v1, 0.0 }
  0x9d   :  { %v302_v32 = vmul.f32 0.0025510204, %v286_v38  ;;  %556 = vadd.xlane.f32.xlu0 %v555_v36  ;;  %v547_v38 = vadd.f32 %v546_v5, %v428_v27 }
  0x9e   :  { %484 = vadd.xlane.f32.xlu2 %v483_v58 }
  0x9f   :  { %v2294_v3 = vsub.f32 %v1936_v55, %v302_v32  ;;  %v2297_v15 = vsub.f32 %v1917_v50, %v302_v32  ;;  %v2303_v56 = vsub.f32 %v1912_v49, %v302_v32  ;;  %v2310_v50 = vsub.f32 %v1929_v53, %v302_v32 }
  0xa0   :  { %v177_v31 = vpop.xlane.xlu1 %176 }
  0xa1   :  { %v390_v41 = vmul.f32 %v2294_v3, %v2294_v3  ;;  %v391_v37 = vmul.f32 %v2297_v15, %v2297_v15  ;;  %v253_v55 = vpop.xlane.xlu0 %252  ;;  %v423_v49 = vmul.f32 %v2303_v56, %v2303_v56  ;;  %v422_v59 = vmul.f32 %v2310_v50, %v2310_v50 }
  0xa2   :  { %v181_v25 = vpop.xlane.xlu2 %180  ;;  %v287_v36 = vadd.f32 %v253_v55, %v189_v29 }
  0xa3   :  { %v470_v13 = vsel %vm149_vm0, %v391_v37, 0.0  ;;  %v534_v32 = vsel %vm149_vm0, %v423_v49, 0.0 }
  0xa4   :  { %v471_v34 = vadd.f32 %v470_v13, %v390_v41  ;;  %v303_v10 = vmul.f32 0.0025510204, %v287_v36  ;;  %548 = vadd.xlane.f32.xlu1 %v547_v38 }
  0xa5   :  { %544 = vadd.xlane.f32.xlu0 %v543_v17  ;;  %v535_v17 = vadd.f32 %v534_v32, %v422_v59 }
  0xa6   :  { %472 = vadd.xlane.f32.xlu2 %v471_v34  ;;  %v2318_v58 = vsub.f32 %v1922_v51, %v303_v10  ;;  %v2321_v53 = vsub.f32 %v1907_v48, %v303_v10  ;;  %v2324_v29 = vsub.f32 %v1968_v7, %v303_v10  ;;  %v2327_v1 = vsub.f32 %v1951_v61, %v303_v10 }
  0xa8   :  { %v245_v39 = vpop.xlane.xlu1 %244  ;;  %v392_v43 = vmul.f32 %v2318_v58, %v2318_v58  ;;  %v393_v27 = vmul.f32 %v2321_v53, %v2321_v53  ;;  %v424_v51 = vmul.f32 %v2324_v29, %v2324_v29  ;;  %v425_v48 = vmul.f32 %v2327_v1, %v2327_v1 }
  0xa9   :  { %v241_v7 = vpop.xlane.xlu0 %240  ;;  %v285_v5 = vadd.f32 %v245_v39, %v181_v25 }
  0xaa   :  { %v169_v41 = vpop.xlane.xlu2 %168  ;;  %v284_v61 = vadd.f32 %v241_v7, %v177_v31  ;;  %v474_v37 = vsel %vm149_vm0, %v393_v27, 0.0  ;;  %v538_v55 = vsel %vm149_vm0, %v425_v48, 0.0 }
  0xab   :  { %v301_v36 = vmul.f32 0.0025510204, %v285_v5  ;;  %v475_v13 = vadd.f32 %v474_v37, %v392_v43  ;;  %v539_v38 = vadd.f32 %v538_v55, %v424_v51 }
  0xac   :  { %v300_v34 = vmul.f32 0.0025510204, %v284_v61  ;;  %536 = vadd.xlane.f32.xlu1 %v535_v17 }
  0xad   :  { %476 = vadd.xlane.f32.xlu0 %v475_v13  ;;  %v2341_v49 = vsub.f32 %v1975_v9, %v301_v36  ;;  %v2344_v10 = vsub.f32 %v1956_v62, %v301_v36  ;;  %v2363_v62 = vsub.f32 %v1985_v20, %v301_v36  ;;  %v2375_v20 = vsub.f32 %v2000_v23, %v301_v36 }
  0xae   :  { %540 = vadd.xlane.f32.xlu2 %v539_v38  ;;  %v2347_v31 = vsub.f32 %v1961_v63, %v300_v34  ;;  %v2350_v25 = vsub.f32 %v1946_v60, %v300_v34  ;;  %v2353_v59 = vsub.f32 %v2007_v30, %v300_v34  ;;  %v2356_v32 = vsub.f32 %v1990_v21, %v300_v34 }
  0xaf   :  { %3152 = vst [vmem:[#allocation27_spill] sm:$0xff] %v2341_v49  ;;  %v388_v39 = vmul.f32 %v2341_v49, %v2341_v49  ;;  %v389_v9 = vmul.f32 %v2344_v10, %v2344_v10  ;;  %v421_v5 = vmul.f32 %v2363_v62, %v2363_v62  ;;  %v420_v23 = vmul.f32 %v2375_v20, %v2375_v20 }
  0xb0   :  { %3153 = vst [vmem:[#allocation28_spill] sm:$0xff] %v2344_v10  ;;  %v233_v63 = vpop.xlane.xlu1 %232  ;;  %v386_v60 = vmul.f32 %v2347_v31, %v2347_v31  ;;  %v387_v30 = vmul.f32 %v2350_v25, %v2350_v25  ;;  %v418_v21 = vmul.f32 %v2353_v59, %v2353_v59  ;;  %v419_v43 = vmul.f32 %v2356_v32, %v2356_v32 }
  0xb1   :  { %3154 = vst [vmem:[#allocation29_spill] sm:$0xff] %v2363_v62  ;;  %v282_v27 = vadd.f32 %v233_v63, %v169_v41  ;;  %v173_v51 = vpop.xlane.xlu0 %172  ;;  %v466_v7 = vsel %vm149_vm0, %v389_v9, 0.0  ;;  %v530_v63 = vsel %vm149_vm0, %v421_v5, 0.0 }
  0xb2   :  { %v237_v48 = vpop.xlane.xlu2 %236  ;;  %3155 = vst [vmem:[#allocation30_spill] sm:$0xff] %v2375_v20  ;;  %v462_v37 = vsel %vm149_vm0, %v387_v30, 0.0  ;;  %v526_v55 = vsel %vm149_vm0, %v419_v43, 0.0  ;;  %v467_v17 = vadd.f32 %v466_v7, %v388_v39 }
  0xb3   :  { %v283_v61 = vadd.f32 %v237_v48, %v173_v51  ;;  %v298_v13 = vmul.f32 0.0025510204, %v282_v27  ;;  %v463_v38 = vadd.f32 %v462_v37, %v386_v60  ;;  %v527_v34 = vadd.f32 %v526_v55, %v418_v21 }
  0xb4   :  { %468 = vadd.xlane.f32.xlu1 %v467_v17 }
  0xb5   :  { %v299_v41 = vmul.f32 0.0025510204, %v283_v61  ;;  %464 = vadd.xlane.f32.xlu0 %v463_v38  ;;  %v2384_v36 = vsub.f32 %v2014_v33, %v298_v13  ;;  %v2387_v9 = vsub.f32 %v1995_v22, %v298_v13  ;;  %v2397_v30 = vsub.f32 %v2024_v44, %v298_v13 }
  0xb6   :  { %528 = vadd.xlane.f32.xlu2 %v527_v34  ;;  %v531_v44 = vadd.f32 %v530_v63, %v420_v23  ;;  %v2412_v7 = vsub.f32 %v2039_v47, %v298_v13 }
  0xb7   :  { %3156 = vst [vmem:[#allocation31_spill] sm:$0xff] %v2384_v36  ;;  %v2391_v39 = vsub.f32 %v2046_v54, %v299_v41  ;;  %v2394_v60 = vsub.f32 %v2029_v45, %v299_v41  ;;  %v382_v21 = vmul.f32 %v2384_v36, %v2384_v36  ;;  %v383_v33 = vmul.f32 %v2387_v9, %v2387_v9 }
  0xb8   :  { %3157 = vst [vmem:[#allocation32_spill] sm:$0xff] %v2387_v9  ;;  %v2404_v22 = vsub.f32 %v2034_v46, %v299_v41  ;;  %v165_v43 = vpop.xlane.xlu1 %164  ;;  %v2415_v5 = vsub.f32 %v2053_v57, %v299_v41  ;;  %v415_v55 = vmul.f32 %v2397_v30, %v2397_v30  ;;  %v414_v47 = vmul.f32 %v2412_v7, %v2412_v7  ;;  %v3165_v41 = vld [vmem:[#allocation7_spill] sm:$0xff]  ;;  %v3181_v9 = vld [vmem:[#allocation12_spill] sm:$0xff] }
  0xb9   :  { %3158 = vst [vmem:[#allocation33_spill] sm:$0xff] %v2391_v39  ;;  %v384_v54 = vmul.f32 %v2391_v39, %v2391_v39  ;;  %v385_v45 = vmul.f32 %v2394_v60, %v2394_v60  ;;  %v161_v51 = vpop.xlane.xlu0 %160  ;;  %v454_v48 = vsel %vm149_vm0, %v383_v33, 0.0 }
  0xba   :  { %3159 = vst [vmem:[#allocation34_spill] sm:$0xff] %v2394_v60  ;;  %v225_v27 = vpop.xlane.xlu2 %224  ;;  %v455_v37 = vadd.f32 %v454_v48, %v382_v21  ;;  %v417_v38 = vmul.f32 %v2404_v22, %v2404_v22  ;;  %v518_v57 = vsel %vm149_vm0, %v415_v55, 0.0  ;;  %v416_v63 = vmul.f32 %v2415_v5, %v2415_v5 }
  0xbb   :  { %3160 = vst [vmem:[#allocation35_spill] sm:$0xff] %v2397_v30  ;;  %v280_v46 = vadd.f32 %v225_v27, %v161_v51  ;;  %v458_v61 = vsel %vm149_vm0, %v385_v45, 0.0  ;;  %v1714_v21 = vmov 0   ;;  %v519_v48 = vadd.f32 %v518_v57, %v414_v47  ;;  %v3171_v47 = vld [vmem:[#allocation8_spill] sm:$0xff]  ;;  %v3179_v30 = vld [vmem:[#allocation15_spill] sm:$0xff] }
  0xbc   :  { %3161 = vst [vmem:[#allocation36_spill] sm:$0xff] %v2404_v22  ;;  %v459_v17 = vadd.f32 %v458_v61, %v384_v54  ;;  %456 = vadd.xlane.f32.xlu1 %v455_v37  ;;  %v522_v33 = vsel %vm149_vm0, %v417_v38, 0.0  ;;  %v3167_v54 = vld [vmem:[#allocation6_spill] sm:$0xff]  ;;  %1654 = vset.pattern.permute.xlu2 %v1714_v21 }
  0xbd   :  { %3162 = vst [vmem:[#allocation37_spill] sm:$0xff] %v2412_v7  ;;  %v296_v34 = vmul.f32 0.0025510204, %v280_v46  ;;  %532 = vadd.xlane.f32.xlu0 %v531_v44  ;;  %1655 = vset.pattern.permute.xlu1 %v1714_v21  ;;  %v3169_v46 = vld [vmem:[#allocation9_spill] sm:$0xff] }
  0xbe   :  { %3163 = vst [vmem:[#allocation38_spill] sm:$0xff] %v2415_v5  ;;  %460 = vadd.xlane.f32.xlu2 %v459_v17  ;;  %1653 = vset.pattern.permute.xlu0 %v1714_v21  ;;  %v523_v17 = vadd.f32 %v522_v33, %v416_v63  ;;  %v3177_v33 = vld [vmem:[#allocation11_spill] sm:$0xff] }
  0xbf   :  { %v2426_v13 = vsub.f32 %v2092_v35, %v296_v34  ;;  %v2429_v23 = vsub.f32 %v3165_v41, %v296_v34  ;;  %v2435_v45 = vsub.f32 %v3167_v54, %v296_v34  ;;  %v2442_v61 = vsub.f32 %v3169_v46, %v296_v34  ;;  %v3173_v34 = vld [vmem:[#allocation5_spill] sm:$0xff] }
  0xc0   :  { %v153_v27 = vpop.xlane.xlu1 %152 }
  0xc1   :  { %3164 = vst [vmem:[#allocation39_spill] sm:$0xff] %v2426_v13  ;;  %v378_v35 = vmul.f32 %v2426_v13, %v2426_v13  ;;  %v379_v51 = vmul.f32 %v2429_v23, %v2429_v23  ;;  %v229_v44 = vpop.xlane.xlu0 %228  ;;  %v411_v41 = vmul.f32 %v2435_v45, %v2435_v45  ;;  %v410_v54 = vmul.f32 %v2442_v61, %v2442_v61 }
  0xc2   :  { %3166 = vst [vmem:[#allocation7_spill] sm:$0xff] %v2429_v23  ;;  %v281_v37 = vadd.f32 %v229_v44, %v165_v43  ;;  %v157_v23 = vpop.xlane.xlu2 %156 }
  0xc3   :  { %3168 = vst [vmem:[#allocation6_spill] sm:$0xff] %v2435_v45  ;;  %v446_v55 = vsel %vm149_vm0, %v379_v51, 0.0  ;;  %v3175_v51 = vld [vmem:[#allocation14_spill] sm:$0xff]  ;;  %v510_v44 = vsel %vm149_vm0, %v411_v41, 0.0 }
  0xc4   :  { %3170 = vst [vmem:[#allocation9_spill] sm:$0xff] %v2442_v61  ;;  %v447_v38 = vadd.f32 %v446_v55, %v378_v35  ;;  %v297_v21 = vmul.f32 0.0025510204, %v281_v37  ;;  %524 = vadd.xlane.f32.xlu1 %v523_v17 }
  0xc5   :  { %520 = vadd.xlane.f32.xlu0 %v519_v48 }
  0xc6   :  { %448 = vadd.xlane.f32.xlu2 %v447_v38  ;;  %v2450_v57 = vsub.f32 %v3171_v47, %v297_v21  ;;  %v2453_v43 = vsub.f32 %v3173_v34, %v297_v21  ;;  %v2456_v63 = vsub.f32 %v3175_v51, %v297_v21  ;;  %v2459_v35 = vsub.f32 %v3177_v33, %v297_v21 }
  0xc7   :  { %v511_v51 = vadd.f32 %v510_v44, %v410_v54  ;;  %v3186_v54 = vld [vmem:[#allocation13_spill] sm:$0xff] }
  0xc8   :  { %3172 = vst [vmem:[#allocation8_spill] sm:$0xff] %v2450_v57  ;;  %v221_v48 = vpop.xlane.xlu1 %220  ;;  %v380_v46 = vmul.f32 %v2450_v57, %v2450_v57  ;;  %v381_v37 = vmul.f32 %v2453_v43, %v2453_v43  ;;  %v412_v55 = vmul.f32 %v2456_v63, %v2456_v63  ;;  %v413_v17 = vmul.f32 %v2459_v35, %v2459_v35 }
  0xc9   :  { %3174 = vst [vmem:[#allocation5_spill] sm:$0xff] %v2453_v43  ;;  %v217_v38 = vpop.xlane.xlu0 %216  ;;  %v279_v47 = vadd.f32 %v221_v48, %v157_v23 }
  0xca   :  { %3176 = vst [vmem:[#allocation14_spill] sm:$0xff] %v2456_v63  ;;  %v278_v34 = vadd.f32 %v217_v38, %v153_v27  ;;  %v450_v21 = vsel %vm149_vm0, %v381_v37, 0.0  ;;  %v514_v41 = vsel %vm149_vm0, %v413_v17, 0.0  ;;  %v3184_v27 = vld [vmem:[#allocation17_spill] sm:$0xff] }
  0xcb   :  { %3178 = vst [vmem:[#allocation11_spill] sm:$0xff] %v2459_v35  ;;  %v295_v33 = vmul.f32 0.0025510204, %v279_v47  ;;  %v451_v45 = vadd.f32 %v450_v21, %v380_v46  ;;  %v515_v61 = vadd.f32 %v514_v41, %v412_v55  ;;  %v3188_v46 = vld [vmem:[#allocation10_spill] sm:$0xff] }
  0xcc   :  { %v294_v13 = vmul.f32 0.0025510204, %v278_v34  ;;  %512 = vadd.xlane.f32.xlu1 %v511_v51  ;;  %v3192_v47 = vld [vmem:[#allocation18_spill] sm:$0xff] }
  0xcd   :  { %452 = vadd.xlane.f32.xlu0 %v451_v45  ;;  %v2473_v7 = vsub.f32 %v3179_v30, %v295_v33  ;;  %v2476_v36 = vsub.f32 %v3181_v9, %v295_v33  ;;  %v3190_v9 = vld [vmem:[#allocation16_spill] sm:$0xff]  ;;  %v2507_v34 = vsub.f32 %v3192_v47, %v295_v33 }
  0xce   :  { %516 = vadd.xlane.f32.xlu2 %v515_v61  ;;  %v2479_v23 = vsub.f32 %v2158_v52, %v294_v13  ;;  %v2482_v48 = vsub.f32 %v3184_v27, %v294_v13  ;;  %v2485_v44 = vsub.f32 %v3186_v54, %v294_v13  ;;  %v2488_v37 = vsub.f32 %v3188_v46, %v294_v13 }
  0xcf   :  { %3180 = vst [vmem:[#allocation15_spill] sm:$0xff] %v2473_v7  ;;  %v376_v45 = vmul.f32 %v2473_v7, %v2473_v7  ;;  %v377_v30 = vmul.f32 %v2476_v36, %v2476_v36  ;;  %v2495_v61 = vsub.f32 %v3190_v9, %v295_v33  ;;  %v408_v9 = vmul.f32 %v2507_v34, %v2507_v34 }
  0xd0   :  { %3182 = vst [vmem:[#allocation12_spill] sm:$0xff] %v2476_v36  ;;  %v406_v52 = vmul.f32 %v2479_v23, %v2479_v23  ;;  %v407_v55 = vmul.f32 %v2482_v48, %v2482_v48  ;;  %v374_v17 = vmul.f32 %v2485_v44, %v2485_v44  ;;  %v375_v13 = vmul.f32 %v2488_v37, %v2488_v37 }
  0xd1   :  { %3183 = vst [vmem:[#allocation40_spill] sm:$0xff] %v2479_v23  ;;  %v442_v38 = vsel %vm149_vm0, %v377_v30, 0.0  ;;  %v409_v27 = vmul.f32 %v2495_v61, %v2495_v61 }
  0xd2   :  { %3185 = vst [vmem:[#allocation17_spill] sm:$0xff] %v2482_v48  ;;  %v502_v21 = vsel %vm149_vm0, %v407_v55, 0.0  ;;  %v438_v41 = vsel %vm149_vm0, %v375_v13, 0.0  ;;  %v443_v51 = vadd.f32 %v442_v38, %v376_v45  ;;  %v962_v55 = vld [vmem:[%s3072_s3 + $0x60] sm:$0xff]  ;;  %v965_v45 = vld [vmem:[%s3072_s3 + $0x78] sm:$0xff]  ;;  %v964_v13 = vld [vmem:[%s3072_s3 + $0x70] sm:$0xff] }
  0xd3   :  { %3187 = vst [vmem:[#allocation13_spill] sm:$0xff] %v2485_v44  ;;  %v503_v54 = vadd.f32 %v502_v21, %v406_v52  ;;  %v439_v46 = vadd.f32 %v438_v41, %v374_v17  ;;  %v506_v30 = vsel %vm149_vm0, %v409_v27, 0.0  ;;  %v961_v52 = vld [vmem:[%s3072_s3 + $0x58] sm:$0xff]  ;;  %v963_v17 = vld [vmem:[%s3072_s3 + $0x68] sm:$0xff]  ;;  %v958_v41 = vld [vmem:[%s3072_s3 + $0x40] sm:$0xff] }
  0xd4   :  { %3189 = vst [vmem:[#allocation10_spill] sm:$0xff] %v2488_v37  ;;  %444 = vadd.xlane.f32.xlu1 %v443_v51  ;;  %v507_v33 = vadd.f32 %v506_v30, %v408_v9  ;;  %v960_v51 = vld [vmem:[%s3072_s3 + $0x50] sm:$0xff] }
  0xd5   :  { %3191 = vst [vmem:[#allocation16_spill] sm:$0xff] %v2495_v61  ;;  %440 = vadd.xlane.f32.xlu0 %v439_v46 }
  0xd6   :  { %3193 = vst [vmem:[#allocation18_spill] sm:$0xff] %v2507_v34  ;;  %504 = vadd.xlane.f32.xlu2 %v503_v54  ;;  %v959_v54 = vld [vmem:[%s3072_s3 + $0x48] sm:$0xff] }
  0xdd   :  { %508 = vadd.xlane.f32.xlu0 %v507_v33 }
  0xed   :  { %1028 = vperm.xlu1 %1655, %v962_v55   ;;  %v955_v55 = vld [vmem:[%s3072_s3 + $0x28] sm:$0xff] }
  0xee   :  { %1043 = vperm.xlu2 %1654, %v965_v45   ;;  %v957_v45 = vld [vmem:[%s3072_s3 + $0x38] sm:$0xff] }
  0xf1   :  { %1038 = vperm.xlu0 %1653, %v964_v13  }
  0xf5   :  { %1023 = vperm.xlu1 %1655, %v961_v52  }
  0xf6   :  { %1033 = vperm.xlu2 %1654, %v963_v17   ;;  %v956_v17 = vld [vmem:[%s3072_s3 + $0x30] sm:$0xff] }
  0xf8   :  { %v497_v38 = vpop.xlane.xlu2 %496  ;;  %v561_v47 = vpop.xlane.xlu1 %560 }
  0xf9   :  { %v580_v21 = vadd.f32 %v561_v47, %v497_v38  ;;  %1013 = vperm.xlu0 %1653, %v959_v54  }
  0xfb   :  { %v596_v27 = vmul.f32 0.0025510204, %v580_v21 }
  0xfd   :  { %v612_v46 = vadd.f32 1e-05, %v596_v27  ;;  %1008 = vperm.xlu1 %1655, %v958_v41  }
  0xfe   :  { %1018 = vperm.xlu2 %1654, %v960_v51  }
  0xff   :  { %1656 = vrsqrt.f32 %v612_v46  ;;  %vm760_vm2 = vweird.f32 %v612_v46 }
 0x100   :  { %v501_v9 = vpop.xlane.xlu0 %500  ;;  %v565_v30 = vpop.xlane.xlu2 %564 }
 0x101   :  { %v581_v33 = vadd.f32 %v565_v30, %v501_v9  ;;  %998 = vperm.xlu0 %1653, %v956_v17   ;;  %v952_v30 = vld [vmem:[%s3072_s3 + $0x10] sm:$0xff] }
 0x103   :  { %v597_v52 = vmul.f32 0.0025510204, %v581_v33  ;;  %v954_v33 = vld [vmem:[%s3072_s3 + $0x20] sm:$0xff] }
 0x105   :  { %v1657_v13 = vpop.eup %1656  ;;  %v613_v38 = vadd.f32 1e-05, %v597_v52  ;;  %993 = vperm.xlu1 %1655, %v955_v55   ;;  %v953_v55 = vld [vmem:[%s3072_s3 + $0x18] sm:$0xff] }
 0x106   :  { %1003 = vperm.xlu2 %1654, %v957_v45   ;;  %v755_v47 = vmul.f32 %v1657_v13, %v612_v46  ;;  %vm761_vm1 = vweird.f32 %v1657_v13 }
 0x107   :  { %1658 = vrsqrt.f32 %v613_v38  ;;  %v493_v21 = vpop.xlane.xlu1 %492  ;;  %vm762_vm3 = vmor %vm760_vm2, %vm761_vm1  ;;  %vm770_vm5 = vweird.f32 %v613_v38 }
 0x108   :  { %v756_v41 = vmul.f32 %v1657_v13, %v755_v47  ;;  %v489_v51 = vpop.xlane.xlu0 %488  ;;  %v553_v27 = vpop.xlane.xlu2 %552 }
 0x109   :  { %v578_v54 = vadd.f32 %v553_v27, %v489_v51  ;;  %983 = vperm.xlu0 %1653, %v953_v55  }
 0x10a   :  { %v757_v9 = vmul.f32 0.5, %v756_v41 }
 0x10b   :  { %v594_v17 = vmul.f32 0.0025510204, %v578_v54 }
 0x10c   :  { %v758_v45 = vsub.f32 1.5, %v757_v9  ;;  %v788_v9 = vld [vmem:[%s3071_s2 + $0x70] sm:$0xff] }
 0x10d   :  { %v1659_v52 = vpop.eup %1658  ;;  %v610_v47 = vadd.f32 1e-05, %v594_v17  ;;  %978 = vperm.xlu1 %1655, %v952_v30  }
 0x10e   :  { %988 = vperm.xlu2 %1654, %v954_v33   ;;  %v765_v41 = vmul.f32 %v1659_v52, %v613_v38  ;;  %v759_v51 = vmul.f32 %v1657_v13, %v758_v45  ;;  %vm771_vm4 = vweird.f32 %v1659_v52 }
 0x10f   :  { %1660 = vrsqrt.f32 %v610_v47  ;;  %v481_v27 = vpop.xlane.xlu1 %480  ;;  %vm772_vm6 = vmor %vm770_vm5, %vm771_vm4  ;;  %vm740_vm8 = vweird.f32 %v610_v47 }
 0x110   :  { %v766_v61 = vmul.f32 %v1659_v52, %v765_v41  ;;  %v557_v34 = vpop.xlane.xlu0 %556  ;;  %v763_v36 = vsel %vm762_vm3, %v1657_v13, %v759_v51  ;;  %v789_v13 = vld [vmem:[%s3071_s2 + $0x78] sm:$0xff] }
 0x111   :  { %v485_v54 = vpop.xlane.xlu2 %484  ;;  %v579_v7 = vadd.f32 %v557_v34, %v493_v21  ;;  %v804_v17 = vmul.f32 %v788_v9, %v763_v36 }
 0x112   :  { %v767_v55 = vmul.f32 0.5, %v766_v61 }
 0x113   :  { %v595_v22 = vmul.f32 0.0025510204, %v579_v7 }
 0x114   :  { %v768_v30 = vsub.f32 1.5, %v767_v55 }
 0x115   :  { %v1661_v46 = vpop.eup %1660  ;;  %v611_v33 = vadd.f32 1e-05, %v595_v22  ;;  %878 = vperm.xlu1 %1655, %v804_v17  }
 0x116   :  { %v735_v45 = vmul.f32 %v1661_v46, %v610_v47  ;;  %v769_v5 = vmul.f32 %v1659_v52, %v768_v30  ;;  %vm741_vm7 = vweird.f32 %v1661_v46 }
 0x117   :  { %1662 = vrsqrt.f32 %v611_v33  ;;  %v549_v41 = vpop.xlane.xlu1 %548  ;;  %vm742_vm9 = vmor %vm740_vm8, %vm741_vm7  ;;  %vm750_vm11 = vweird.f32 %v611_v33 }
 0x118   :  { %v736_v51 = vmul.f32 %v1661_v46, %v735_v45  ;;  %v545_v34 = vpop.xlane.xlu0 %544  ;;  %v577_v7 = vadd.f32 %v549_v41, %v485_v54  ;;  %v773_v36 = vsel %vm772_vm6, %v1659_v52, %v769_v5  ;;  %v786_v5 = vld [vmem:[%s3071_s2 + $0x60] sm:$0xff] }
 0x119   :  { %v473_v61 = vpop.xlane.xlu2 %472  ;;  %v576_v21 = vadd.f32 %v545_v34, %v481_v27  ;;  %v805_v9 = vmul.f32 %v789_v13, %v773_v36 }
 0x11a   :  { %v737_v55 = vmul.f32 0.5, %v736_v51  ;;  %v593_v22 = vmul.f32 0.0025510204, %v577_v7 }
 0x11b   :  { %v592_v17 = vmul.f32 0.0025510204, %v576_v21  ;;  %883 = vperm.xlu2 %1654, %v805_v9  }
 0x11c   :  { %v738_v38 = vsub.f32 1.5, %v737_v55  ;;  %v609_v30 = vadd.f32 1e-05, %v593_v22 }
 0x11d   :  { %v1663_v60 = vpop.eup %1662  ;;  %v608_v39 = vadd.f32 1e-05, %v592_v17 }
 0x11e   :  { %v745_v48 = vmul.f32 %v1663_v60, %v611_v33  ;;  %1664 = vrsqrt.f32 %v609_v30  ;;  %v739_v23 = vmul.f32 %v1661_v46, %v738_v38  ;;  %vm751_vm10 = vweird.f32 %v1663_v60 }
 0x11f   :  { %1666 = vrsqrt.f32 %v608_v39  ;;  %v537_v45 = vpop.xlane.xlu1 %536  ;;  %vm752_vm12 = vmor %vm750_vm11, %vm751_vm10  ;;  %vm730_vm15 = vweird.f32 %v609_v30  ;;  %vm720_vm1 = vweird.f32 %v608_v39 }
 0x120   :  { %v746_v52 = vmul.f32 %v1663_v60, %v745_v48  ;;  %v477_v27 = vpop.xlane.xlu0 %476  ;;  %v574_v13 = vadd.f32 %v537_v45, %v473_v61  ;;  %v743_v51 = vsel %vm742_vm9, %v1661_v46, %v739_v23  ;;  %v787_v45 = vld [vmem:[%s3071_s2 + $0x68] sm:$0xff] }
 0x121   :  { %v541_v54 = vpop.xlane.xlu2 %540  ;;  %v802_v36 = vmul.f32 %v786_v5, %v743_v51 }
 0x122   :  { %v575_v41 = vadd.f32 %v541_v54, %v477_v27  ;;  %v747_v34 = vmul.f32 0.5, %v746_v52  ;;  %v590_v7 = vmul.f32 0.0025510204, %v574_v13 }
 0x123   :  { %868 = vperm.xlu1 %1655, %v802_v36  }
 0x124   :  { %v591_v21 = vmul.f32 0.0025510204, %v575_v41  ;;  %v1665_v9 = vpop.eup %1664  ;;  %v748_v47 = vsub.f32 1.5, %v747_v34  ;;  %v2567_v55 = vadd.f32 1e-05, %v590_v7 }
 0x125   :  { %v1667_v22 = vpop.eup %1666  ;;  %v725_v17 = vmul.f32 %v1665_v9, %v609_v30  ;;  %vm731_vm13 = vweird.f32 %v1665_v9 }
 0x126   :  { %v2569_v38 = vadd.f32 1e-05, %v591_v21  ;;  %v715_v48 = vmul.f32 %v1667_v22, %v608_v39  ;;  %1668 = vrsqrt.f32 %v2567_v55  ;;  %v749_v46 = vmul.f32 %v1663_v60, %v748_v47  ;;  %vm732_vm2 = vmor %vm730_vm15, %vm731_vm13 }
 0x127   :  { %v726_v61 = vmul.f32 %v1665_v9, %v725_v17  ;;  %v469_v23 = vpop.xlane.xlu1 %468  ;;  %vm721_vm14 = vweird.f32 %v1667_v22  ;;  %vm700_vm6 = vweird.f32 %v2567_v55 }
 0x128   :  { %1670 = vrsqrt.f32 %v2569_v38  ;;  %v716_v5 = vmul.f32 %v1667_v22, %v715_v48  ;;  %v465_v52 = vpop.xlane.xlu0 %464  ;;  %v753_v41 = vsel %vm752_vm12, %v1663_v60, %v749_v46  ;;  %v785_v60 = vld [vmem:[%s3071_s2 + $0x58] sm:$0xff]  ;;  %vm722_vm3 = vmor %vm720_vm1, %vm721_vm14  ;;  %vm710_vm7 = vweird.f32 %v2569_v38 }
 0x129   :  { %v529_v27 = vpop.xlane.xlu2 %528  ;;  %v727_v54 = vmul.f32 0.5, %v726_v61  ;;  %v803_v34 = vmul.f32 %v787_v45, %v753_v41  ;;  %v784_v45 = vld [vmem:[%s3071_s2 + $0x50] sm:$0xff] }
 0x12a   :  { %v572_v13 = vadd.f32 %v529_v27, %v465_v52  ;;  %v717_v51 = vmul.f32 0.5, %v716_v5 }
 0x12b   :  { %v728_v7 = vsub.f32 1.5, %v727_v54  ;;  %873 = vperm.xlu2 %1654, %v803_v34  }
 0x12c   :  { %v588_v33 = vmul.f32 0.0025510204, %v572_v13  ;;  %v1669_v36 = vpop.eup %1668  ;;  %v718_v21 = vsub.f32 1.5, %v717_v51 }
 0x12d   :  { %v695_v17 = vmul.f32 %v1669_v36, %v2567_v55  ;;  %v729_v48 = vmul.f32 %v1665_v9, %v728_v7  ;;  %vm701_vm4 = vweird.f32 %v1669_v36 }
 0x12e   :  { %v1671_v47 = vpop.eup %1670  ;;  %v2577_v37 = vadd.f32 1e-05, %v588_v33  ;;  %v719_v46 = vmul.f32 %v1667_v22, %v718_v21  ;;  %vm702_vm8 = vmor %vm700_vm6, %vm701_vm4 }
 0x12f   :  { %v705_v61 = vmul.f32 %v1671_v47, %v2569_v38  ;;  %v696_v30 = vmul.f32 %v1669_v36, %v695_v17  ;;  %v457_v5 = vpop.xlane.xlu1 %456  ;;  %v733_v52 = vsel %vm732_vm2, %v1665_v9, %v729_v48  ;;  %vm711_vm5 = vweird.f32 %v1671_v47 }
 0x130   :  { %1672 = vrsqrt.f32 %v2577_v37  ;;  %v533_v54 = vpop.xlane.xlu0 %532  ;;  %v723_v41 = vsel %vm722_vm3, %v1667_v22, %v719_v46  ;;  %v801_v51 = vmul.f32 %v785_v60, %v733_v52  ;;  %v782_v22 = vld [vmem:[%s3071_s2 + $0x40] sm:$0xff]  ;;  %vm712_vm9 = vmor %vm710_vm7, %vm711_vm5  ;;  %vm680_vm11 = vweird.f32 %v2577_v37 }
 0x131   :  { %v706_v27 = vmul.f32 %v1671_v47, %v705_v61  ;;  %v461_v13 = vpop.xlane.xlu2 %460  ;;  %v697_v39 = vmul.f32 0.5, %v696_v30  ;;  %v573_v34 = vadd.f32 %v533_v54, %v469_v23  ;;  %v800_v7 = vmul.f32 %v784_v45, %v723_v41  ;;  %v783_v61 = vld [vmem:[%s3071_s2 + $0x48] sm:$0xff] }
 0x132   :  { %863 = vperm.xlu0 %1653, %v801_v51  }
 0x133   :  { %v707_v33 = vmul.f32 0.5, %v706_v27  ;;  %v698_v21 = vsub.f32 1.5, %v697_v39  ;;  %v589_v44 = vmul.f32 0.0025510204, %v573_v34  ;;  %858 = vperm.xlu1 %1655, %v800_v7  }
 0x135   :  { %v708_v62 = vsub.f32 1.5, %v707_v33  ;;  %v2588_v9 = vadd.f32 1e-05, %v589_v44  ;;  %v699_v48 = vmul.f32 %v1669_v36, %v698_v21 }
 0x136   :  { %v1673_v17 = vpop.eup %1672 }
 0x137   :  { %v675_v23 = vmul.f32 %v1673_v17, %v2577_v37  ;;  %v709_v60 = vmul.f32 %v1671_v47, %v708_v62  ;;  %1674 = vrsqrt.f32 %v2588_v9  ;;  %v525_v44 = vpop.xlane.xlu1 %524  ;;  %v703_v55 = vsel %vm702_vm8, %v1669_v36, %v699_v48 }
 0x138   :  { %v521_v45 = vpop.xlane.xlu0 %520  ;;  %v571_v52 = vadd.f32 %v525_v44, %v461_v13  ;;  %v798_v54 = vmul.f32 %v782_v22, %v703_v55  ;;  %vm681_vm10 = vweird.f32 %v1673_v17  ;;  %vm690_vm14 = vweird.f32 %v2588_v9 }
 0x139   :  { %v676_v46 = vmul.f32 %v1673_v17, %v675_v23  ;;  %v449_v30 = vpop.xlane.xlu2 %448  ;;  %v713_v27 = vsel %vm712_vm9, %v1671_v47, %v709_v60  ;;  %v570_v38 = vadd.f32 %v521_v45, %v457_v5  ;;  %v780_v5 = vld [vmem:[%s3071_s2 + $0x30] sm:$0xff]  ;;  %vm682_vm12 = vmor %vm680_vm11, %vm681_vm10 }
 0x13a   :  { %v799_v41 = vmul.f32 %v783_v61, %v713_v27  ;;  %v587_v39 = vmul.f32 0.0025510204, %v571_v52  ;;  %848 = vperm.xlu0 %1653, %v798_v54  }
 0x13b   :  { %v677_v51 = vmul.f32 0.5, %v676_v46  ;;  %v586_v62 = vmul.f32 0.0025510204, %v570_v38 }
 0x13c   :  { %853 = vperm.xlu2 %1654, %v799_v41   ;;  %v603_v7 = vadd.f32 1e-05, %v587_v39 }
 0x13d   :  { %v678_v34 = vsub.f32 1.5, %v677_v51  ;;  %v1675_v33 = vpop.eup %1674  ;;  %v602_v21 = vadd.f32 1e-05, %v586_v62  ;;  %v781_v62 = vld [vmem:[%s3071_s2 + $0x38] sm:$0xff] }
 0x13e   :  { %v685_v36 = vmul.f32 %v1675_v33, %v2588_v9  ;;  %1676 = vrsqrt.f32 %v603_v7  ;;  %vm691_vm13 = vweird.f32 %v1675_v33  ;;  %vm670_vm3 = vweird.f32 %v603_v7 }
 0x13f   :  { %1678 = vrsqrt.f32 %v602_v21  ;;  %v513_v47 = vpop.xlane.xlu1 %512  ;;  %v679_v13 = vmul.f32 %v1673_v17, %v678_v34  ;;  %vm692_vm15 = vmor %vm690_vm14, %vm691_vm13  ;;  %vm660_vm4 = vweird.f32 %v602_v21 }
 0x140   :  { %v686_v48 = vmul.f32 %v1675_v33, %v685_v36  ;;  %v453_v22 = vpop.xlane.xlu0 %452  ;;  %v568_v60 = vadd.f32 %v513_v47, %v449_v30 }
 0x141   :  { %v517_v23 = vpop.xlane.xlu2 %516  ;;  %v683_v44 = vsel %vm682_vm12, %v1673_v17, %v679_v13 }
 0x142   :  { %v569_v61 = vadd.f32 %v517_v23, %v453_v22  ;;  %v687_v55 = vmul.f32 0.5, %v686_v48  ;;  %v584_v46 = vmul.f32 0.0025510204, %v568_v60  ;;  %v796_v45 = vmul.f32 %v780_v5, %v683_v44 }
 0x144   :  { %v585_v52 = vmul.f32 0.0025510204, %v569_v61  ;;  %v1677_v27 = vpop.eup %1676  ;;  %v688_v37 = vsub.f32 1.5, %v687_v55  ;;  %v2604_v54 = vadd.f32 1e-05, %v584_v46  ;;  %838 = vperm.xlu2 %1654, %v796_v45  }
 0x145   :  { %v1679_v38 = vpop.eup %1678  ;;  %v665_v41 = vmul.f32 %v1677_v27, %v603_v7  ;;  %vm671_vm1 = vweird.f32 %v1677_v27 }
 0x146   :  { %v2606_v51 = vadd.f32 1e-05, %v585_v52  ;;  %v655_v39 = vmul.f32 %v1679_v38, %v602_v21  ;;  %1680 = vrsqrt.f32 %v2604_v54  ;;  %v689_v30 = vmul.f32 %v1675_v33, %v688_v37  ;;  %v779_v37 = vld [vmem:[%s3071_s2 + $0x28] sm:$0xff]  ;;  %vm672_vm5 = vmor %vm670_vm3, %vm671_vm1 }
 0x147   :  { %v666_v17 = vmul.f32 %v1677_v27, %v665_v41  ;;  %vm661_vm2 = vweird.f32 %v1679_v38  ;;  %v445_v41 = vpop.xlane.xlu1 %444  ;;  %vm640_vm9 = vweird.f32 %v2604_v54 }
 0x148   :  { %1682 = vrsqrt.f32 %v2606_v51  ;;  %v656_v34 = vmul.f32 %v1679_v38, %v655_v39  ;;  %v441_v47 = vpop.xlane.xlu0 %440  ;;  %v693_v48 = vsel %vm692_vm15, %v1675_v33, %v689_v30  ;;  %vm662_vm6 = vmor %vm660_vm4, %vm661_vm2  ;;  %vm650_vm10 = vweird.f32 %v2606_v51 }
 0x149   :  { %v505_v36 = vpop.xlane.xlu2 %504  ;;  %v667_v13 = vmul.f32 0.5, %v666_v17  ;;  %v797_v23 = vmul.f32 %v781_v62, %v693_v48  ;;  %v778_v17 = vld [vmem:[%s3071_s2 + $0x20] sm:$0xff] }
 0x14a   :  { %v566_v5 = vadd.f32 %v505_v36, %v441_v47  ;;  %v657_v22 = vmul.f32 0.5, %v656_v34 }
 0x14b   :  { %v668_v60 = vsub.f32 1.5, %v667_v13  ;;  %843 = vperm.xlu1 %1655, %v797_v23  }
 0x14c   :  { %v582_v9 = vmul.f32 0.0025510204, %v566_v5  ;;  %v1681_v61 = vpop.eup %1680  ;;  %v658_v44 = vsub.f32 1.5, %v657_v22 }
 0x14d   :  { %v635_v46 = vmul.f32 %v1681_v61, %v2604_v54  ;;  %v669_v52 = vmul.f32 %v1677_v27, %v668_v60  ;;  %vm641_vm7 = vweird.f32 %v1681_v61 }
 0x14e   :  { %v1683_v55 = vpop.eup %1682  ;;  %v598_v45 = vadd.f32 1e-05, %v582_v9  ;;  %v659_v39 = vmul.f32 %v1679_v38, %v658_v44  ;;  %vm642_vm11 = vmor %vm640_vm9, %vm641_vm7 }
 0x14f   :  { %v645_v33 = vmul.f32 %v1683_v55, %v2606_v51  ;;  %v636_v7 = vmul.f32 %v1681_v61, %v635_v46  ;;  %v673_v30 = vsel %vm672_vm5, %v1677_v27, %v669_v52  ;;  %vm651_vm8 = vweird.f32 %v1683_v55 }
 0x150   :  { %1684 = vrsqrt.f32 %v598_v45  ;;  %v509_v36 = vpop.xlane.xlu0 %508  ;;  %v663_v47 = vsel %vm662_vm6, %v1679_v38, %v659_v39  ;;  %v795_v13 = vmul.f32 %v779_v37, %v673_v30  ;;  %v776_v38 = vld [vmem:[%s3071_s2 + $0x10] sm:$0xff]  ;;  %vm652_vm12 = vmor %vm650_vm10, %vm651_vm8  ;;  %vm620_vm14 = vweird.f32 %v598_v45 }
 0x151   :  { %v646_v62 = vmul.f32 %v1683_v55, %v645_v33  ;;  %v2622_v34 = vpop.permute.xlu2 %1043  ;;  %v637_v21 = vmul.f32 0.5, %v636_v7  ;;  %v567_v5 = vadd.f32 %v509_v36, %v445_v41  ;;  %v794_v48 = vmul.f32 %v778_v17, %v663_v47  ;;  %v777_v33 = vld [vmem:[%s3071_s2 + $0x18] sm:$0xff] }
 0x152   :  { %833 = vperm.xlu0 %1653, %v795_v13  }
 0x153   :  { %v647_v22 = vmul.f32 0.5, %v646_v62  ;;  %v638_v23 = vsub.f32 1.5, %v637_v21  ;;  %v583_v60 = vmul.f32 0.0025510204, %v567_v5  ;;  %828 = vperm.xlu1 %1655, %v794_v48   ;;  %v774_v21 = vld [vmem:[%s3071_s2] sm:$0xff] }
 0x155   :  { %v648_v9 = vsub.f32 1.5, %v647_v22  ;;  %v599_v27 = vadd.f32 1e-05, %v583_v60  ;;  %v639_v46 = vmul.f32 %v1681_v61, %v638_v23 }
 0x156   :  { %v1685_v44 = vpop.eup %1684 }
 0x157   :  { %v615_v52 = vmul.f32 %v1685_v44, %v598_v45  ;;  %v649_v37 = vmul.f32 %v1683_v55, %v648_v9  ;;  %1686 = vrsqrt.f32 %v599_v27  ;;  %v643_v41 = vsel %vm642_vm11, %v1681_v61, %v639_v46  ;;  %v775_v46 = vld [vmem:[%s3071_s2 + $0x8] sm:$0xff]  ;;  %s1717_s2 = smov 16  }
 0x158   :  { %v792_v7 = vmul.f32 %v776_v38, %v643_v41  ;;  %vm621_vm13 = vweird.f32 %v1685_v44  ;;  %vm630_vm2 = vweird.f32 %v599_v27 }
 0x159   :  { %v616_v39 = vmul.f32 %v1685_v44, %v615_v52  ;;  %v2632_v54 = vpop.permute.xlu2 %1033  ;;  %v653_v17 = vsel %vm652_vm12, %v1683_v55, %v649_v37  ;;  %vm622_vm15 = vmor %vm620_vm14, %vm621_vm13  ;;  %v950_v55 = vld [vmem:[%s3072_s3] sm:$0xff] }
 0x15a   :  { %v793_v30 = vmul.f32 %v777_v33, %v653_v17  ;;  %818 = vperm.xlu0 %1653, %v792_v7  }
 0x15b   :  { %v617_v62 = vmul.f32 0.5, %v616_v39 }
 0x15c   :  { %823 = vperm.xlu2 %1654, %v793_v30  }
 0x15d   :  { %v618_v51 = vsub.f32 1.5, %v617_v62  ;;  %v1687_v36 = vpop.eup %1686  ;;  %v3198_v62 = vld [vmem:[#allocation23_spill] sm:$0xff] }
 0x15e   :  { %v625_v47 = vmul.f32 %v1687_v36, %v599_v27  ;;  %vm631_vm1 = vweird.f32 %v1687_v36 }
 0x15f   :  { %v619_v13 = vmul.f32 %v1685_v44, %v618_v51  ;;  %v2637_v61 = vpop.permute.xlu1 %1028  ;;  %vm632_vm3 = vmor %vm630_vm2, %vm631_vm1 }
 0x160   :  { %v626_v5 = vmul.f32 %v1687_v36, %v625_v47 }
 0x161   :  { %v2642_v48 = vpop.permute.xlu2 %1018  ;;  %v623_v22 = vsel %vm622_vm15, %v1685_v44, %v619_v13  ;;  %v951_v44 = vld [vmem:[%s3072_s3 + $0x8] sm:$0xff] }
 0x162   :  { %v790_v23 = vmul.f32 %v774_v21, %v623_v22  ;;  %v627_v60 = vmul.f32 0.5, %v626_v5  ;;  %968 = vperm.xlu0 %1653, %v950_v55   ;;  %v115_v22 = vld [vmem:[%s3070_s1 + $0xf0] sm:$0xff] }
 0x163   :  { %v1039_v13 = vpop.permute.xlu0 %1038 }
 0x164   :  { %808 = vperm.xlu2 %1654, %v790_v23   ;;  %v628_v45 = vsub.f32 1.5, %v627_v60  ;;  %v148_v23 = vld [vmem:[%s3070_s1 + $0x1f8] sm:$0xff] }
 0x166   :  { %v629_v9 = vmul.f32 %v1687_v36, %v628_v45 }
 0x167   :  { %v2647_v38 = vpop.permute.xlu1 %1023 }
 0x168   :  { %v633_v37 = vsel %vm632_vm3, %v1687_v36, %v629_v9 }
 0x169   :  { %v2649_v52 = vpop.permute.xlu2 %1003  ;;  %v791_v33 = vmul.f32 %v775_v46, %v633_v37 }
 0x16a   :  { %3194 = vst [vmem:[#allocation41_spill] sm:$0xff] %v2649_v52 }
 0x16b   :  { %813 = vperm.xlu1 %1655, %v791_v33  }
 0x16c   :  { %973 = vperm.xlu2 %1654, %v951_v44   ;;  %v2682_v44 = vpop.permute.xlu0 %1013 }
 0x16f   :  { %v2654_v41 = vpop.permute.xlu1 %1008 }
 0x170   :  { %3195 = vst [vmem:[#allocation42_spill] sm:$0xff] %v2654_v41 }
 0x171   :  { %v2656_v27 = vpop.permute.xlu2 %988 }
 0x172   :  { %3196 = vst [vmem:[#allocation43_spill] sm:$0xff] %v2656_v27 }
 0x174   :  { %v2720_v63 = vpop.permute.xlu0 %998 }
 0x177   :  { %v2658_v39 = vpop.permute.xlu1 %993 }
 0x178   :  { %3197 = vst [vmem:[#allocation44_spill] sm:$0xff] %v2658_v39 }
 0x179   :  { %v884_v17 = vpop.permute.xlu2 %883 }
 0x17a   :  { %v916_v7 = vmul.f32 %v884_v17, %v2187_v12  ;;  %v917_v30 = vmul.f32 %v884_v17, %v2190_v16  ;;  %v948_v51 = vmul.f32 %v884_v17, %v3198_v62  ;;  %v949_v47 = vmul.f32 %v884_v17, %v2196_v8  ;;  %v116_v16 = vld [vmem:[%s3070_s1 + $0xf8] sm:$0xff]  ;;  %v147_v8 = vld [vmem:[%s3070_s1 + $0x1f0] sm:$0xff] }
 0x17c   :  { %v1076_v36 = vadd.f32 %v2622_v34, %v916_v7  ;;  %v1077_v21 = vadd.f32 %v2622_v34, %v917_v30  ;;  %v1108_v55 = vadd.f32 %v2622_v34, %v948_v51  ;;  %v1109_v5 = vadd.f32 %v2622_v34, %v949_v47 }
 0x17e   :  { %v1140_v60 = vadd.f32 %v1076_v36, %v115_v22  ;;  %v1141_v34 = vadd.f32 %v1077_v21, %v116_v16  ;;  %v1172_v45 = vadd.f32 %v1108_v55, %v147_v8  ;;  %v1173_v9 = vadd.f32 %v1109_v5, %v148_v23  ;;  %v3200_v36 = vld [vmem:[#allocation19_spill] sm:$0xff]  ;;  %v3201_v55 = vld [vmem:[#allocation20_spill] sm:$0xff]  ;;  %v3202_v22 = vld [vmem:[#allocation21_spill] sm:$0xff] }
 0x17f   :  { %v2671_v12 = vpop.permute.xlu1 %978  ;;  %v3203_v8 = vld [vmem:[#allocation22_spill] sm:$0xff] }
 0x180   :  { %3199 = vst [vmem:[#allocation23_spill] sm:$0xff] %v2671_v12  ;;  %v1204_v37 = vmax.f32 %v1140_v60, 0.0  ;;  %v1205_v33 = vmax.f32 %v1141_v34, 0.0  ;;  %v1236_v17 = vmax.f32 %v1172_v45, 0.0  ;;  %v1237_v7 = vmax.f32 %v1173_v9, 0.0  ;;  %v113_v60 = vld [vmem:[%s3070_s1 + $0xe0] sm:$0xff] }
 0x181   :  { %v145_v45 = vld [vmem:[%s3070_s1 + $0x1e0] sm:$0xff]  ;;  %v146_v9 = vld [vmem:[%s3070_s1 + $0x1e8] sm:$0xff] }
 0x185   :  { %v874_v46 = vpop.permute.xlu2 %873 }
 0x186   :  { %v912_v30 = vmul.f32 %v874_v46, %v2209_v18  ;;  %v913_v62 = vmul.f32 %v874_v46, %v2212_v40  ;;  %v944_v51 = vmul.f32 %v874_v46, %v2243_v24  ;;  %v945_v47 = vmul.f32 %v874_v46, %v2231_v14  ;;  %v111_v18 = vld [vmem:[%s3070_s1 + $0xd0] sm:$0xff] }
 0x187   :  { %v879_v12 = vpop.permute.xlu1 %878 }
 0x188   :  { %v914_v21 = vmul.f32 %v879_v12, %v3200_v36  ;;  %v915_v5 = vmul.f32 %v879_v12, %v3201_v55  ;;  %v946_v16 = vmul.f32 %v879_v12, %v3202_v22  ;;  %v947_v23 = vmul.f32 %v879_v12, %v3203_v8  ;;  %v114_v12 = vld [vmem:[%s3070_s1 + $0xe8] sm:$0xff] }
 0x189   :  { %v1072_v40 = vadd.f32 %v2632_v54, %v912_v30  ;;  %v1073_v14 = vadd.f32 %v2632_v54, %v913_v62  ;;  %v1104_v24 = vadd.f32 %v2632_v54, %v944_v51  ;;  %v1105_v34 = vadd.f32 %v2632_v54, %v945_v47  ;;  %v112_v54 = vld [vmem:[%s3070_s1 + $0xd8] sm:$0xff]  ;;  %v143_v51 = vld [vmem:[%s3070_s1 + $0x1d0] sm:$0xff] }
 0x18a   :  { %v1074_v46 = vadd.f32 %v1039_v13, %v914_v21  ;;  %v1075_v30 = vadd.f32 %v1039_v13, %v915_v5  ;;  %v1106_v36 = vadd.f32 %v1039_v13, %v946_v16  ;;  %v1107_v62 = vadd.f32 %v1039_v13, %v947_v23  ;;  %v144_v47 = vld [vmem:[%s3070_s1 + $0x1d8] sm:$0xff] }
 0x18b   :  { %v1253_v55 = vpack.c.bf16 %v1205_v33, %v1204_v37  ;;  %v1269_v22 = vpack.c.bf16 %v1237_v7, %v1236_v17  ;;  %v1136_v16 = vadd.f32 %v1072_v40, %v111_v18  ;;  %v1137_v13 = vadd.f32 %v1073_v14, %v112_v54  ;;  %v3206_v54 = vld [vmem:[#allocation26_spill] sm:$0xff] }
 0x18c   :  { %v1138_v8 = vadd.f32 %v1074_v46, %v113_v60  ;;  %v1139_v27 = vadd.f32 %v1075_v30, %v114_v12  ;;  %v1170_v21 = vadd.f32 %v1106_v36, %v145_v45  ;;  %v1171_v5 = vadd.f32 %v1107_v62, %v146_v9  ;;  %v3204_v36 = vld [vmem:[#allocation24_spill] sm:$0xff]  ;;  %v3205_v62 = vld [vmem:[#allocation25_spill] sm:$0xff] }
 0x18d   :  { %v1168_v23 = vadd.f32 %v1104_v24, %v143_v51  ;;  %v1169_v39 = vadd.f32 %v1105_v34, %v144_v47  ;;  %v1348_v35 = vunpack.c.l.b16 %v1253_v55  ;;  %v1349_v57 = vunpack.c.h.b16 %v1253_v55  ;;  %v135_v51 = vld [vmem:[%s3070_s1 + $0x190] sm:$0xff]  ;;  %v136_v47 = vld [vmem:[%s3070_s1 + $0x198] sm:$0xff] }
 0x18e   :  { %v1202_v52 = vmax.f32 %v1138_v8, 0.0  ;;  %v1203_v20 = vmax.f32 %v1139_v27, 0.0  ;;  %v1234_v10 = vmax.f32 %v1170_v21, 0.0  ;;  %v1235_v49 = vmax.f32 %v1171_v5, 0.0  ;;  %v110_v21 = vld [vmem:[%s3070_s1 + $0xc8] sm:$0xff]  ;;  %v141_v5 = vld [vmem:[%s3070_s1 + $0x1c0] sm:$0xff] }
 0x18f   :  { %v1502_v37 = vunpack.c.l.b16 %v1269_v22  ;;  %v1200_v33 = vmax.f32 %v1136_v16, 0.0  ;;  %v1201_v17 = vmax.f32 %v1137_v13, 0.0  ;;  %v1232_v7 = vmax.f32 %v1168_v23, 0.0  ;;  %v142_v16 = vld [vmem:[%s3070_s1 + $0x1c8] sm:$0xff] }
 0x190   :  { %v1252_v43 = vpack.c.bf16 %v1203_v20, %v1202_v52  ;;  %v1268_v41 = vpack.c.bf16 %v1235_v49, %v1234_v10  ;;  %v1233_v60 = vmax.f32 %v1169_v39, 0.0  ;;  %v1503_v24 = vunpack.c.h.b16 %v1269_v22 }
 0x191   :  { %v2722_v30 = vpack.c.bf16 %v1201_v17, %v1200_v33  ;;  %v2766_v33 = vpop.permute.xlu0 %983 }
 0x192   :  { %v1346_v12 = vunpack.c.l.b16 %v1252_v43  ;;  %v1347_v18 = vunpack.c.h.b16 %v1252_v43  ;;  %v1500_v40 = vunpack.c.l.b16 %v1268_v41  ;;  %v1501_v14 = vunpack.c.h.b16 %v1268_v41 }
 0x193   :  { %v2724_v20 = vpack.c.bf16 %v1233_v60, %v1232_v7 }
 0x194   :  { %v1364_v34 = vpack.c.b16 %v1348_v35, %v1346_v12  ;;  %v1365_v27 = vpack.c.b16 %v1349_v57, %v1347_v18  ;;  %v1518_v45 = vpack.c.b16 %v1502_v37, %v1500_v40  ;;  %v1519_v46 = vpack.c.b16 %v1503_v24, %v1501_v14  ;;  %v109_v57 = vld [vmem:[%s3070_s1 + $0xc0] sm:$0xff]  ;;  %v103_v35 = vld [vmem:[%s3070_s1 + $0x90] sm:$0xff] }
 0x195   :  { %v869_v39 = vpop.permute.xlu1 %868 }
 0x196   :  { %v854_v9 = vpop.permute.xlu2 %853  ;;  %1382 = vmatpush.bf16.msra.mxu0 %v1364_v34  ;;  %v910_v41 = vmul.f32 %v869_v39, %v2215_v11  ;;  %1411 = vmatpush.bf16.msra.mxu1 %v1365_v27 }
 0x197   :  { %v904_v49 = vmul.f32 %v854_v9, %v2318_v58  ;;  %v905_v10 = vmul.f32 %v854_v9, %v2321_v53  ;;  %v936_v52 = vmul.f32 %v854_v9, %v2324_v29  ;;  %v937_v43 = vmul.f32 %v854_v9, %v2327_v1  ;;  %v104_v1 = vld [vmem:[%s3070_s1 + $0x98] sm:$0xff]  ;;  %1536 = vmatpush.bf16.msra.mxu2 %v1518_v45 }
 0x198   :  { %v911_v58 = vmul.f32 %v869_v39, %v3204_v36  ;;  %v942_v53 = vmul.f32 %v869_v39, %v3205_v62  ;;  %v943_v29 = vmul.f32 %v869_v39, %v3206_v54  ;;  %v1070_v13 = vadd.f32 %v2637_v61, %v910_v41  ;;  %1565 = vmatpush.bf16.msra.mxu3 %v1519_v46  ;;  %v97_v54 = vld [vmem:[%s3070_s1 + $0x60] sm:$0xff] }
 0x199   :  { %v1064_v11 = vadd.f32 %v2682_v44, %v904_v49  ;;  %v1065_v55 = vadd.f32 %v2682_v44, %v905_v10  ;;  %v1096_v22 = vadd.f32 %v2682_v44, %v936_v52  ;;  %v1097_v8 = vadd.f32 %v2682_v44, %v937_v43 }
 0x19a   :  { %v1071_v23 = vadd.f32 %v2637_v61, %v911_v58  ;;  %v1102_v37 = vadd.f32 %v2637_v61, %v942_v53  ;;  %v1103_v44 = vadd.f32 %v2637_v61, %v943_v29  ;;  %v1134_v18 = vadd.f32 %v1070_v13, %v109_v57 }
 0x19b   :  { %v1128_v17 = vadd.f32 %v1064_v11, %v103_v35  ;;  %v1129_v7 = vadd.f32 %v1065_v55, %v104_v1  ;;  %v1160_v60 = vadd.f32 %v1096_v22, %v135_v51  ;;  %v1161_v12 = vadd.f32 %v1097_v8, %v136_v47 }
 0x19c   :  { %v1135_v40 = vadd.f32 %v1071_v23, %v110_v21  ;;  %v1166_v14 = vadd.f32 %v1102_v37, %v141_v5  ;;  %v1167_v24 = vadd.f32 %v1103_v44, %v142_v16  ;;  %v1198_v49 = vmax.f32 %v1134_v18, 0.0 }
 0x19d   :  { %v1192_v34 = vmax.f32 %v1128_v17, 0.0  ;;  %v1193_v27 = vmax.f32 %v1129_v7, 0.0  ;;  %v1224_v45 = vmax.f32 %v1160_v60, 0.0  ;;  %v1225_v9 = vmax.f32 %v1161_v12, 0.0 }
 0x19e   :  { %v1199_v10 = vmax.f32 %v1135_v40, 0.0  ;;  %v1230_v52 = vmax.f32 %v1166_v14, 0.0  ;;  %v1231_v43 = vmax.f32 %v1167_v24, 0.0  ;;  %v839_v61 = vpop.permute.xlu2 %838  ;;  %v1344_v46 = vunpack.c.l.b16 %v2722_v30  ;;  %v107_v40 = vld [vmem:[%s3070_s1 + $0xb0] sm:$0xff]  ;;  %v140_v14 = vld [vmem:[%s3070_s1 + $0x1b8] sm:$0xff] }
 0x19f   :  { %v898_v39 = vmul.f32 %v839_v61, %v2347_v31  ;;  %v899_v35 = vmul.f32 %v839_v61, %v2350_v25  ;;  %v930_v57 = vmul.f32 %v839_v61, %v2353_v59  ;;  %v1345_v41 = vunpack.c.h.b16 %v2722_v30  ;;  %v98_v31 = vld [vmem:[%s3070_s1 + $0x68] sm:$0xff] }
 0x1a0   :  { %v1250_v36 = vpack.c.bf16 %v1199_v10, %v1198_v49  ;;  %v1266_v58 = vpack.c.bf16 %v1231_v43, %v1230_v52  ;;  %v1498_v62 = vunpack.c.l.b16 %v2724_v20  ;;  %v1499_v53 = vunpack.c.h.b16 %v2724_v20  ;;  %v138_v43 = vld [vmem:[%s3070_s1 + $0x1a8] sm:$0xff] }
 0x1a1   :  { %v1058_v25 = vadd.f32 %v2720_v63, %v898_v39  ;;  %v1059_v59 = vadd.f32 %v2720_v63, %v899_v35  ;;  %v2783_v29 = vpack.c.bf16 %v1193_v27, %v1192_v34  ;;  %v2785_v30 = vpack.c.bf16 %v1225_v9, %v1224_v45  ;;  %v137_v9 = vld [vmem:[%s3070_s1 + $0x1a0] sm:$0xff] }
 0x1a2   :  { %v1342_v1 = vunpack.c.l.b16 %v1250_v36  ;;  %v1343_v51 = vunpack.c.h.b16 %v1250_v36  ;;  %v1496_v47 = vunpack.c.l.b16 %v1266_v58  ;;  %v1497_v20 = vunpack.c.h.b16 %v1266_v58 }
 0x1a3   :  { %v2788_v11 = vmul.f32 %v839_v61, %v2356_v32  ;;  %v2791_v55 = vadd.f32 %v2720_v63, %v930_v57  ;;  %v2793_v22 = vadd.f32 %v1058_v25, %v97_v54  ;;  %v2795_v8 = vadd.f32 %v1059_v59, %v98_v31 }
 0x1a4   :  { %v1362_v21 = vpack.c.b16 %v1344_v46, %v1342_v1  ;;  %v1363_v5 = vpack.c.b16 %v1345_v41, %v1343_v51  ;;  %v1516_v16 = vpack.c.b16 %v1498_v62, %v1496_v47  ;;  %v1517_v13 = vpack.c.b16 %v1499_v53, %v1497_v20  ;;  %v864_v23 = vpop.permute.xlu0 %863 }
 0x1a5   :  { %v908_v37 = vmul.f32 %v864_v23, %v2259_v2  ;;  %v909_v44 = vmul.f32 %v864_v23, %v2262_v6  ;;  %v940_v17 = vmul.f32 %v864_v23, %v2283_v4  ;;  %v941_v32 = vmul.f32 %v864_v23, %v2272_v26  ;;  %v859_v7 = vpop.permute.xlu1 %858  ;;  %v108_v2 = vld [vmem:[%s3070_s1 + $0xb8] sm:$0xff]  ;;  %v139_v6 = vld [vmem:[%s3070_s1 + $0x1b0] sm:$0xff]  ;;  %v106_v4 = vld [vmem:[%s3070_s1 + $0xa8] sm:$0xff] }
 0x1a6   :  { %1383 = vmatpush.bf16.msra.mxu0 %v1362_v21  ;;  %1412 = vmatpush.bf16.msra.mxu1 %v1363_v5  ;;  %v906_v60 = vmul.f32 %v859_v7, %v2252_v0  ;;  %v907_v12 = vmul.f32 %v859_v7, %v2255_v19  ;;  %v938_v18 = vmul.f32 %v859_v7, %v2280_v28  ;;  %v105_v28 = vld [vmem:[%s3070_s1 + $0xa0] sm:$0xff] }
 0x1a7   :  { %1537 = vmatpush.bf16.msra.mxu2 %v1516_v16  ;;  %1566 = vmatpush.bf16.msra.mxu3 %v1517_v13  ;;  %v1068_v0 = vadd.f32 %v2647_v38, %v908_v37  ;;  %v1069_v19 = vadd.f32 %v2647_v38, %v909_v44  ;;  %v1100_v26 = vadd.f32 %v2647_v38, %v940_v17  ;;  %v101_v5 = vld [vmem:[%s3070_s1 + $0x80] sm:$0xff]  ;;  %v102_v16 = vld [vmem:[%s3070_s1 + $0x88] sm:$0xff] }
 0x1a8   :  { %v1101_v24 = vadd.f32 %v2647_v38, %v941_v32  ;;  %v939_v34 = vmul.f32 %v859_v7, %v2265_v42  ;;  %v1066_v27 = vadd.f32 %v2642_v48, %v906_v60  ;;  %v1067_v45 = vadd.f32 %v2642_v48, %v907_v12  ;;  %v3207_v13 = vld [vmem:[#allocation42_spill] sm:$0xff]  ;;  %v133_v23 = vld [vmem:[%s3070_s1 + $0x180] sm:$0xff] }
 0x1a9   :  { %v1098_v49 = vadd.f32 %v2642_v48, %v938_v18  ;;  %v1132_v10 = vadd.f32 %v1068_v0, %v107_v40  ;;  %v1133_v52 = vadd.f32 %v1069_v19, %v108_v2  ;;  %v1164_v61 = vadd.f32 %v1100_v26, %v139_v6  ;;  %v134_v37 = vld [vmem:[%s3070_s1 + $0x188] sm:$0xff] }
 0x1aa   :  { %v1099_v38 = vadd.f32 %v2642_v48, %v939_v34  ;;  %v1130_v42 = vadd.f32 %v1066_v27, %v105_v28  ;;  %v1131_v46 = vadd.f32 %v1067_v45, %v106_v4  ;;  %v1165_v39 = vadd.f32 %v1101_v24, %v140_v14 }
 0x1ab   :  { %v1196_v35 = vmax.f32 %v1132_v10, 0.0  ;;  %v1197_v57 = vmax.f32 %v1133_v52, 0.0  ;;  %v1162_v41 = vadd.f32 %v1098_v49, %v137_v9  ;;  %v1228_v36 = vmax.f32 %v1164_v61, 0.0  ;;  %v129_v61 = vld [vmem:[%s3070_s1 + $0x160] sm:$0xff] }
 0x1ac   :  { %v849_v58 = vpop.permute.xlu0 %848  ;;  %v1194_v62 = vmax.f32 %v1130_v42, 0.0  ;;  %v1195_v53 = vmax.f32 %v1131_v46, 0.0  ;;  %v1163_v54 = vadd.f32 %v1099_v38, %v138_v43  ;;  %v1229_v31 = vmax.f32 %v1165_v39, 0.0  ;;  %v3208_v38 = vld [vmem:[#allocation8_spill] sm:$0xff]  ;;  %v3209_v46 = vld [vmem:[#allocation5_spill] sm:$0xff] }
 0x1ad   :  { %v902_v25 = vmul.f32 %v849_v58, %v2294_v3  ;;  %v903_v59 = vmul.f32 %v849_v58, %v2297_v15  ;;  %v934_v1 = vmul.f32 %v849_v58, %v2310_v50  ;;  %v935_v48 = vmul.f32 %v849_v58, %v2303_v56  ;;  %v130_v58 = vld [vmem:[%s3070_s1 + $0x168] sm:$0xff] }
 0x1ae   :  { %v1248_v51 = vpack.c.bf16 %v1195_v53, %v1194_v62  ;;  %v1249_v47 = vpack.c.bf16 %v1197_v57, %v1196_v35  ;;  %v1226_v20 = vmax.f32 %v1162_v41, 0.0  ;;  %v1227_v21 = vmax.f32 %v1163_v54, 0.0 }
 0x1af   :  { %v1062_v3 = vadd.f32 %v3207_v13, %v902_v25  ;;  %v1063_v15 = vadd.f32 %v3207_v13, %v903_v59  ;;  %v1094_v50 = vadd.f32 %v3207_v13, %v934_v1  ;;  %v1095_v56 = vadd.f32 %v3207_v13, %v935_v48  ;;  %v92_v1 = vld [vmem:[%s3070_s1 + $0x38] sm:$0xff]  ;;  %v3210_v48 = vld [vmem:[#allocation14_spill] sm:$0xff] }
 0x1b0   :  { %v1338_v44 = vunpack.c.l.b16 %v1248_v51  ;;  %v1340_v17 = vunpack.c.l.b16 %v1249_v47  ;;  %v1339_v32 = vunpack.c.h.b16 %v1248_v51  ;;  %v1341_v7 = vunpack.c.h.b16 %v1249_v47  ;;  %v3211_v47 = vld [vmem:[#allocation11_spill] sm:$0xff] }
 0x1b1   :  { %v1264_v60 = vpack.c.bf16 %v1227_v21, %v1226_v20  ;;  %v1265_v12 = vpack.c.bf16 %v1229_v31, %v1228_v36  ;;  %v1126_v18 = vadd.f32 %v1062_v3, %v101_v5  ;;  %v1127_v40 = vadd.f32 %v1063_v15, %v102_v16 }
 0x1b2   :  { %v1360_v2 = vpack.c.b16 %v1340_v17, %v1338_v44  ;;  %v1361_v6 = vpack.c.b16 %v1341_v7, %v1339_v32  ;;  %v1158_v0 = vadd.f32 %v1094_v50, %v133_v23  ;;  %v1159_v19 = vadd.f32 %v1095_v56, %v134_v37  ;;  %v3212_v7 = vld [vmem:[#allocation27_spill] sm:$0xff] }
 0x1b3   :  { %v1492_v26 = vunpack.c.l.b16 %v1264_v60  ;;  %v1494_v28 = vunpack.c.l.b16 %v1265_v12  ;;  %v1493_v4 = vunpack.c.h.b16 %v1264_v60  ;;  %v1495_v14 = vunpack.c.h.b16 %v1265_v12  ;;  %v3213_v12 = vld [vmem:[#allocation28_spill] sm:$0xff] }
 0x1b4   :  { %1384 = vmatpush.bf16.msra.mxu0 %v1360_v2  ;;  %1413 = vmatpush.bf16.msra.mxu1 %v1361_v6  ;;  %v1190_v24 = vmax.f32 %v1126_v18, 0.0  ;;  %v1191_v34 = vmax.f32 %v1127_v40, 0.0  ;;  %v1222_v27 = vmax.f32 %v1158_v0, 0.0  ;;  %v1223_v45 = vmax.f32 %v1159_v19, 0.0  ;;  %v3214_v40 = vld [vmem:[#allocation30_spill] sm:$0xff]  ;;  %v3215_v6 = vld [vmem:[#allocation29_spill] sm:$0xff] }
 0x1b5   :  { %v1091_v9 = vadd.f32 %v2720_v63, %v2788_v11  ;;  %v1514_v49 = vpack.c.b16 %v1494_v28, %v1492_v26  ;;  %v1515_v10 = vpack.c.b16 %v1495_v14, %v1493_v4  ;;  %v1336_v43 = vunpack.c.l.b16 %v2783_v29  ;;  %v99_v19 = vld [vmem:[%s3070_s1 + $0x70] sm:$0xff]  ;;  %v124_v26 = vld [vmem:[%s3070_s1 + $0x138] sm:$0xff] }
 0x1b6   :  { %v824_v52 = vpop.permute.xlu2 %823  ;;  %v1186_v35 = vmax.f32 %v2793_v22, 0.0  ;;  %v1187_v57 = vmax.f32 %v2795_v8, 0.0  ;;  %v1246_v63 = vpack.c.bf16 %v1191_v34, %v1190_v24  ;;  %v1337_v11 = vunpack.c.h.b16 %v2783_v29  ;;  %v91_v29 = vld [vmem:[%s3070_s1 + $0x30] sm:$0xff]  ;;  %v100_v28 = vld [vmem:[%s3070_s1 + $0x78] sm:$0xff] }
 0x1b7   :  { %v892_v42 = vmul.f32 %v824_v52, %v3208_v38  ;;  %v893_v39 = vmul.f32 %v824_v52, %v3209_v46  ;;  %1538 = vmatpush.bf16.msra.mxu2 %v1514_v49  ;;  %1567 = vmatpush.bf16.msra.mxu3 %v1515_v10  ;;  %v1262_v41 = vpack.c.bf16 %v1223_v45, %v1222_v27  ;;  %v1490_v36 = vunpack.c.l.b16 %v2785_v30  ;;  %v131_v14 = vld [vmem:[%s3070_s1 + $0x170] sm:$0xff]  ;;  %v132_v24 = vld [vmem:[%s3070_s1 + $0x178] sm:$0xff] }
 0x1b8   :  { %v1491_v22 = vunpack.c.h.b16 %v2785_v30  ;;  %v1154_v8 = vadd.f32 %v2791_v55, %v129_v61  ;;  %v1334_v54 = vunpack.c.l.b16 %v1246_v63  ;;  %v1335_v31 = vunpack.c.h.b16 %v1246_v63  ;;  %v3217_v61 = vld [vmem:[#allocation13_spill] sm:$0xff] }
 0x1b9   :  { %v1052_v62 = vadd.f32 %v2766_v33, %v892_v42  ;;  %v1053_v53 = vadd.f32 %v2766_v33, %v893_v39  ;;  %v1488_v25 = vunpack.c.l.b16 %v1262_v41  ;;  %v1489_v59 = vunpack.c.h.b16 %v1262_v41  ;;  %v3218_v42 = vld [vmem:[#allocation10_spill] sm:$0xff] }
 0x1ba   :  { %v924_v51 = vmul.f32 %v824_v52, %v3210_v48  ;;  %v925_v20 = vmul.f32 %v824_v52, %v3211_v47  ;;  %v2884_v21 = vpack.c.bf16 %v1187_v57, %v1186_v35  ;;  %v1155_v30 = vadd.f32 %v1091_v9, %v130_v58  ;;  %v3216_v9 = vld [vmem:[#allocation41_spill] sm:$0xff] }
 0x1bb   :  { %v1358_v55 = vpack.c.b16 %v1336_v43, %v1334_v54  ;;  %v1359_v5 = vpack.c.b16 %v1337_v11, %v1335_v31  ;;  %v1512_v16 = vpack.c.b16 %v1490_v36, %v1488_v25  ;;  %v1513_v13 = vpack.c.b16 %v1491_v22, %v1489_v59  ;;  %v3221_v31 = vld [vmem:[#allocation33_spill] sm:$0xff]  ;;  %v3222_v59 = vld [vmem:[#allocation34_spill] sm:$0xff] }
 0x1bc   :  { %v1218_v3 = vmax.f32 %v1154_v8, 0.0  ;;  %v1219_v15 = vmax.f32 %v1155_v30, 0.0  ;;  %v1116_v50 = vadd.f32 %v1052_v62, %v91_v29  ;;  %v1117_v56 = vadd.f32 %v1053_v53, %v92_v1  ;;  %v3219_v53 = vld [vmem:[#allocation40_spill] sm:$0xff]  ;;  %v3220_v8 = vld [vmem:[#allocation17_spill] sm:$0xff]  ;;  %v3223_v1 = vld [vmem:[#allocation38_spill] sm:$0xff] }
 0x1bd   :  { %1385 = vmatpush.bf16.msra.mxu0 %v1358_v55  ;;  %1414 = vmatpush.bf16.msra.mxu1 %v1359_v5  ;;  %v1084_v23 = vadd.f32 %v2766_v33, %v924_v51  ;;  %v1085_v37 = vadd.f32 %v2766_v33, %v925_v20  ;;  %v844_v44 = vpop.permute.xlu1 %843  ;;  %v1330_v17 = vunpack.c.l.b16 %v2884_v21  ;;  %v123_v33 = vld [vmem:[%s3070_s1 + $0x130] sm:$0xff]  ;;  %v1331_v4 = vunpack.c.h.b16 %v2884_v21  ;;  %v3224_v51 = vld [vmem:[#allocation36_spill] sm:$0xff]  ;;  %v126_v21 = vld [vmem:[%s3070_s1 + $0x148] sm:$0xff] }
 0x1be   :  { %1539 = vmatpush.bf16.msra.mxu2 %v1512_v16  ;;  %1568 = vmatpush.bf16.msra.mxu3 %v1513_v13  ;;  %v809_v32 = vpop.permute.xlu2 %808  ;;  %v900_v60 = vmul.f32 %v844_v44, %v3212_v7  ;;  %v901_v18 = vmul.f32 %v844_v44, %v3213_v12  ;;  %v932_v2 = vmul.f32 %v844_v44, %v3214_v40  ;;  %v1180_v27 = vmax.f32 %v1116_v50, 0.0  ;;  %v95_v13 = vld [vmem:[%s3070_s1 + $0x50] sm:$0xff] }
 0x1bf   :  { %v933_v0 = vmul.f32 %v844_v44, %v3215_v6  ;;  %v2912_v34 = vpack.c.bf16 %v1219_v15, %v1218_v3  ;;  %v1181_v45 = vmax.f32 %v1117_v56, 0.0  ;;  %v2919_v38 = vmul.f32 %v809_v32, %v3217_v61  ;;  %v96_v3 = vld [vmem:[%s3070_s1 + $0x58] sm:$0xff] }
 0x1c0   :  { %v1060_v49 = vadd.f32 %v3216_v9, %v900_v60  ;;  %v1061_v10 = vadd.f32 %v3216_v9, %v901_v18  ;;  %v1092_v52 = vadd.f32 %v3216_v9, %v932_v2  ;;  %v2922_v46 = vmul.f32 %v809_v32, %v3218_v42  ;;  %v3225_v15 = vld [vmem:[#allocation44_spill] sm:$0xff]  ;;  %v3228_v18 = vld [vmem:[#allocation37_spill] sm:$0xff] }
 0x1c1   :  { %v1093_v43 = vadd.f32 %v3216_v9, %v933_v0  ;;  %v2924_v39 = vadd.f32 %v1084_v23, %v123_v33  ;;  %v2926_v35 = vadd.f32 %v1085_v37, %v124_v26  ;;  %v1484_v58 = vunpack.c.l.b16 %v2912_v34  ;;  %v3227_v60 = vld [vmem:[#allocation32_spill] sm:$0xff]  ;;  %v93_v0 = vld [vmem:[%s3070_s1 + $0x40] sm:$0xff] }
 0x1c2   :  { %v1124_v57 = vadd.f32 %v1060_v49, %v99_v19  ;;  %v1125_v63 = vadd.f32 %v1061_v10, %v100_v28  ;;  %v1156_v11 = vadd.f32 %v1092_v52, %v131_v14  ;;  %v1485_v62 = vunpack.c.h.b16 %v2912_v34  ;;  %v94_v19 = vld [vmem:[%s3070_s1 + $0x48] sm:$0xff]  ;;  %v3229_v28 = vld [vmem:[#allocation35_spill] sm:$0xff] }
 0x1c3   :  { %v1157_v41 = vadd.f32 %v1093_v43, %v132_v24  ;;  %v2931_v22 = vmul.f32 %v809_v32, %v3219_v53  ;;  %v2934_v54 = vmul.f32 %v809_v32, %v3220_v8  ;;  %v2949_v37 = vpack.c.bf16 %v1181_v45, %v1180_v27  ;;  %v3226_v32 = vld [vmem:[#allocation31_spill] sm:$0xff] }
 0x1c4   :  { %v834_v36 = vpop.permute.xlu0 %833  ;;  %v1188_v30 = vmax.f32 %v1124_v57, 0.0  ;;  %v1189_v55 = vmax.f32 %v1125_v63, 0.0  ;;  %v1220_v5 = vmax.f32 %v1156_v11, 0.0  ;;  %v3230_v24 = vld [vmem:[#allocation43_spill] sm:$0xff]  ;;  %v125_v11 = vld [vmem:[%s3070_s1 + $0x140] sm:$0xff] }
 0x1c5   :  { %v896_v25 = vmul.f32 %v834_v36, %v3221_v31  ;;  %v897_v29 = vmul.f32 %v834_v36, %v3222_v59  ;;  %v928_v48 = vmul.f32 %v834_v36, %v3223_v1  ;;  %v929_v47 = vmul.f32 %v834_v36, %v3224_v51  ;;  %v829_v20 = vpop.permute.xlu1 %828 }
 0x1c6   :  { %v1221_v16 = vmax.f32 %v1157_v41, 0.0  ;;  %v894_v7 = vmul.f32 %v829_v20, %v3226_v32  ;;  %v895_v12 = vmul.f32 %v829_v20, %v3227_v60  ;;  %v926_v40 = vmul.f32 %v829_v20, %v3228_v18 }
 0x1c7   :  { %v1056_v50 = vadd.f32 %v3225_v15, %v896_v25  ;;  %v1057_v56 = vadd.f32 %v3225_v15, %v897_v29  ;;  %v1088_v23 = vadd.f32 %v3225_v15, %v928_v48  ;;  %v1089_v44 = vadd.f32 %v3225_v15, %v929_v47  ;;  %v3231_v25 = vld [vmem:[#allocation39_spill] sm:$0xff]  ;;  %v3233_v48 = vld [vmem:[#allocation9_spill] sm:$0xff]  ;;  %v90_v15 = vld [vmem:[%s3070_s1 + $0x28] sm:$0xff] }
 0x1c8   :  { %v1245_v2 = vpack.c.bf16 %v1189_v55, %v1188_v30  ;;  %v1261_v6 = vpack.c.bf16 %v1221_v16, %v1220_v5  ;;  %v927_v14 = vmul.f32 %v829_v20, %v3229_v28  ;;  %v1054_v34 = vadd.f32 %v3230_v24, %v894_v7  ;;  %v3232_v29 = vld [vmem:[#allocation7_spill] sm:$0xff] }
 0x1c9   :  { %v1120_v33 = vadd.f32 %v1056_v50, %v95_v13  ;;  %v1121_v26 = vadd.f32 %v1057_v56, %v96_v3  ;;  %v1055_v27 = vadd.f32 %v3230_v24, %v895_v12  ;;  %v1086_v45 = vadd.f32 %v3230_v24, %v926_v40  ;;  %v3235_v5 = vld [vmem:[#allocation23_spill] sm:$0xff]  ;;  %v89_v3 = vld [vmem:[%s3070_s1 + $0x20] sm:$0xff] }
 0x1ca   :  { %v1332_v9 = vunpack.c.l.b16 %v1245_v2  ;;  %v1333_v49 = vunpack.c.h.b16 %v1245_v2  ;;  %v1486_v10 = vunpack.c.l.b16 %v1261_v6  ;;  %v1487_v52 = vunpack.c.h.b16 %v1261_v6 }
 0x1cb   :  { %v1118_v61 = vadd.f32 %v1054_v34, %v93_v0  ;;  %v1119_v42 = vadd.f32 %v1055_v27, %v94_v19  ;;  %v1184_v57 = vmax.f32 %v1120_v33, 0.0  ;;  %v1185_v63 = vmax.f32 %v1121_v26, 0.0 }
 0x1cc   :  { %v819_v43 = vpop.permute.xlu0 %818  ;;  %v1356_v41 = vpack.c.b16 %v1332_v9, %v1330_v17  ;;  %v1357_v36 = vpack.c.b16 %v1333_v49, %v1331_v4  ;;  %v1510_v53 = vpack.c.b16 %v1486_v10, %v1484_v58  ;;  %v1511_v8 = vpack.c.b16 %v1487_v52, %v1485_v62  ;;  %v127_v17 = vld [vmem:[%s3070_s1 + $0x150] sm:$0xff]  ;;  %v128_v4 = vld [vmem:[%s3070_s1 + $0x158] sm:$0xff]  ;;  %v3234_v62 = vld [vmem:[#allocation6_spill] sm:$0xff] }
 0x1cd   :  { %v1087_v31 = vadd.f32 %v3230_v24, %v927_v14  ;;  %v890_v59 = vmul.f32 %v819_v43, %v3231_v25  ;;  %v891_v1 = vmul.f32 %v819_v43, %v3232_v29  ;;  %v922_v51 = vmul.f32 %v819_v43, %v3233_v48  ;;  %v85_v52 = vld [vmem:[%s3070_s1] sm:$0xff] }
 0x1ce   :  { %1386 = vmatpush.bf16.msra.mxu0 %v1356_v41  ;;  %1415 = vmatpush.bf16.msra.mxu1 %v1357_v36  ;;  %v1182_v47 = vmax.f32 %v1118_v61, 0.0  ;;  %v1183_v20 = vmax.f32 %v1119_v42, 0.0  ;;  %v1243_v30 = vpack.c.bf16 %v1185_v63, %v1184_v57  ;;  %v1150_v58 = vadd.f32 %v1086_v45, %v125_v11  ;;  %v122_v57 = vld [vmem:[%s3070_s1 + $0x128] sm:$0xff] }
 0x1cf   :  { %1540 = vmatpush.bf16.msra.mxu2 %v1510_v53  ;;  %1569 = vmatpush.bf16.msra.mxu3 %v1511_v8  ;;  %v923_v55 = vmul.f32 %v819_v43, %v3234_v62  ;;  %v1050_v16 = vadd.f32 %v3235_v5, %v890_v59  ;;  %v1051_v13 = vadd.f32 %v3235_v5, %v891_v1  ;;  %v1212_v50 = vmax.f32 %v2924_v39, 0.0  ;;  %v121_v39 = vld [vmem:[%s3070_s1 + $0x120] sm:$0xff]  ;;  %v86_v43 = vld [vmem:[%s3070_s1 + $0x8] sm:$0xff] }
 0x1d0   :  { %v1082_v56 = vadd.f32 %v3235_v5, %v922_v51  ;;  %v1242_v32 = vpack.c.bf16 %v1183_v20, %v1182_v47  ;;  %v1328_v7 = vunpack.c.l.b16 %v1243_v30  ;;  %v1329_v60 = vunpack.c.h.b16 %v1243_v30  ;;  %v118_v8 = vld [vmem:[%s3070_s1 + $0x108] sm:$0xff] }
 0x1d1   :  { %v1151_v12 = vadd.f32 %v1087_v31, %v126_v21  ;;  %v1152_v18 = vadd.f32 %v1088_v23, %v127_v17  ;;  %v1153_v40 = vadd.f32 %v1089_v44, %v128_v4  ;;  %v1214_v2 = vmax.f32 %v1150_v58, 0.0 }
 0x1d2   :  { %v1326_v6 = vunpack.c.l.b16 %v1242_v32  ;;  %v1327_v0 = vunpack.c.h.b16 %v1242_v32  ;;  %v1114_v19 = vadd.f32 %v1050_v16, %v89_v3  ;;  %v1115_v33 = vadd.f32 %v1051_v13, %v90_v15  ;;  %v974_v32 = vpop.permute.xlu2 %973 }
 0x1d3   :  { %v1215_v26 = vmax.f32 %v1151_v12, 0.0  ;;  %v1216_v28 = vmax.f32 %v1152_v18, 0.0  ;;  %v1217_v14 = vmax.f32 %v1153_v40, 0.0  ;;  %v1213_v34 = vmax.f32 %v2926_v35, 0.0  ;;  %v117_v35 = vld [vmem:[%s3070_s1 + $0x100] sm:$0xff]  ;;  %v3237_v12 = vld [vmem:[#allocation12_spill] sm:$0xff] }
 0x1d4   :  { %v969_v24 = vpop.permute.xlu0 %968  ;;  %v1354_v27 = vpack.c.b16 %v1328_v7, %v1326_v6  ;;  %v1355_v45 = vpack.c.b16 %v1329_v60, %v1327_v0  ;;  %v1083_v9 = vadd.f32 %v3235_v5, %v923_v55  ;;  %v1178_v61 = vmax.f32 %v1114_v19, 0.0  ;;  %v87_v60 = vld [vmem:[%s3070_s1 + $0x10] sm:$0xff] }
 0x1d5   :  { %v1046_v23 = vadd.f32 %v969_v24, %v2919_v38  ;;  %v1047_v44 = vadd.f32 %v969_v24, %v2922_v46  ;;  %v1258_v49 = vpack.c.bf16 %v1215_v26, %v1214_v2  ;;  %v1259_v10 = vpack.c.bf16 %v1217_v14, %v1216_v28  ;;  %v3239_v2 = vld [vmem:[#allocation16_spill] sm:$0xff]  ;;  %v119_v28 = vld [vmem:[%s3070_s1 + $0x110] sm:$0xff] }
 0x1d6   :  { %v1078_v38 = vadd.f32 %v969_v24, %v2931_v22  ;;  %1387 = vmatpush.bf16.msra.mxu0 %v1354_v27  ;;  %1416 = vmatpush.bf16.msra.mxu1 %v1355_v45  ;;  %v1079_v46 = vadd.f32 %v969_v24, %v2934_v54  ;;  %v1179_v42 = vmax.f32 %v1115_v33, 0.0  ;;  %v1146_v63 = vadd.f32 %v1082_v56, %v121_v39  ;;  %v88_v26 = vld [vmem:[%s3070_s1 + $0x18] sm:$0xff] }
 0x1d7   :  { %v1480_v11 = vunpack.c.l.b16 %v1258_v49  ;;  %v1482_v41 = vunpack.c.l.b16 %v1259_v10  ;;  %v1481_v36 = vunpack.c.h.b16 %v1258_v49  ;;  %v1483_v53 = vunpack.c.h.b16 %v1259_v10  ;;  %v120_v14 = vld [vmem:[%s3070_s1 + $0x118] sm:$0xff] }
 0x1d8   :  { %v1110_v22 = vadd.f32 %v1046_v23, %v85_v52  ;;  %v1111_v31 = vadd.f32 %v1047_v44, %v86_v43  ;;  %v1142_v25 = vadd.f32 %v1078_v38, %v117_v35  ;;  %v1257_v59 = vpack.c.bf16 %v1213_v34, %v1212_v50  ;;  %v3236_v50 = vld [vmem:[#allocation15_spill] sm:$0xff] }
 0x1d9   :  { %v1508_v54 = vpack.c.b16 %v1482_v41, %v1480_v11  ;;  %v1509_v29 = vpack.c.b16 %v1483_v53, %v1481_v36  ;;  %v1240_v1 = vpack.c.bf16 %v1179_v42, %v1178_v61  ;;  %v1147_v48 = vadd.f32 %v1083_v9, %v122_v57 }
 0x1da   :  { %v1143_v51 = vadd.f32 %v1079_v46, %v118_v8  ;;  %v1324_v47 = vunpack.c.l.b16 %v2949_v37  ;;  %v1210_v20 = vmax.f32 %v1146_v63, 0.0  ;;  %v1325_v17 = vunpack.c.h.b16 %v2949_v37  ;;  %v3238_v37 = vld [vmem:[#allocation18_spill] sm:$0xff] }
 0x1db   :  { %1541 = vmatpush.bf16.msra.mxu2 %v1508_v54  ;;  %1570 = vmatpush.bf16.msra.mxu3 %v1509_v29  ;;  %v1322_v30 = vunpack.c.l.b16 %v1240_v1  ;;  %v1323_v21 = vunpack.c.h.b16 %v1240_v1  ;;  %v1211_v4 = vmax.f32 %v1147_v48, 0.0  ;;  %v1174_v58 = vmax.f32 %v1110_v22, 0.0  ;;  %v1645_v1 = vld [vmem:[%s3073_s4] sm:$0xff]  ;;  %v1646_v48 = vld [vmem:[%s3073_s4 + $0x8] sm:$0xff] }
 0x1dc   :  { %v1175_v62 = vmax.f32 %v1111_v31, 0.0  ;;  %v1206_v55 = vmax.f32 %v1142_v25, 0.0  ;;  %v1478_v5 = vunpack.c.l.b16 %v1257_v59  ;;  %v1207_v7 = vmax.f32 %v1143_v51, 0.0  ;;  %v1647_v51 = vld [vmem:[%s3073_s4 + $0x10] sm:$0xff] }
 0x1dd   :  { %v814_v16 = vpop.permute.xlu1 %813  ;;  %v1352_v13 = vpack.c.b16 %v1324_v47, %v1322_v30  ;;  %v1353_v3 = vpack.c.b16 %v1325_v17, %v1323_v21  ;;  %v1256_v15 = vpack.c.bf16 %v1211_v4, %v1210_v20  ;;  %v1479_v33 = vunpack.c.h.b16 %v1257_v59  ;;  %v1648_v47 = vld [vmem:[%s3073_s4 + $0x18] sm:$0xff]  ;;  %s1715_s4 = smov [#allocation2]  }
 0x1de   :  { %v888_v56 = vmul.f32 %v814_v16, %v3236_v50  ;;  %v889_v18 = vmul.f32 %v814_v16, %v3237_v12  ;;  %v920_v40 = vmul.f32 %v814_v16, %v3238_v37  ;;  %v921_v6 = vmul.f32 %v814_v16, %v3239_v2  ;;  %s1615_s27 = sshll.u32 %s1715_s4, 4  ;;  %s1616_s27 = int_to_ptr.vmem [resolvable:$true] %s1615_s27 }
 0x1df   :  { %1388 = vmatpush.bf16.msra.mxu0 %v1352_v13  ;;  %1417 = vmatpush.bf16.msra.mxu1 %v1353_v3  ;;  %v1476_v0 = vunpack.c.l.b16 %v1256_v15  ;;  %v1477_v19 = vunpack.c.h.b16 %v1256_v15  ;;  %v1238_v43 = vpack.c.bf16 %v1175_v62, %v1174_v58  ;;  %v1254_v35 = vpack.c.bf16 %v1207_v7, %v1206_v55 }
 0x1e0   :  { %v1048_v24 = vadd.f32 %v974_v32, %v888_v56  ;;  %v1049_v39 = vadd.f32 %v974_v32, %v889_v18  ;;  %v1080_v34 = vadd.f32 %v974_v32, %v920_v40  ;;  %v1081_v27 = vadd.f32 %v974_v32, %v921_v6 }
 0x1e1   :  { %v1506_v45 = vpack.c.b16 %v1478_v5, %v1476_v0  ;;  %v1507_v23 = vpack.c.b16 %v1479_v33, %v1477_v19  ;;  %v1318_v63 = vunpack.c.l.b16 %v1238_v43  ;;  %v1319_v11 = vunpack.c.h.b16 %v1238_v43 }
 0x1e2   :  { %v1112_v44 = vadd.f32 %v1048_v24, %v87_v60  ;;  %v1113_v9 = vadd.f32 %v1049_v39, %v88_v26  ;;  %v1144_v49 = vadd.f32 %v1080_v34, %v119_v28  ;;  %v1145_v10 = vadd.f32 %v1081_v27, %v120_v14 }
 0x1e3   :  { %1542 = vmatpush.bf16.msra.mxu2 %v1506_v45  ;;  %1571 = vmatpush.bf16.msra.mxu3 %v1507_v23  ;;  %v1472_v41 = vunpack.c.l.b16 %v1254_v35  ;;  %v1473_v36 = vunpack.c.h.b16 %v1254_v35 }
 0x1e4   :  { %v1176_v52 = vmax.f32 %v1112_v44, 0.0  ;;  %v1177_v38 = vmax.f32 %v1113_v9, 0.0  ;;  %v1208_v46 = vmax.f32 %v1144_v49, 0.0  ;;  %v1209_v61 = vmax.f32 %v1145_v10, 0.0 }
 0x1e6   :  { %v1239_v42 = vpack.c.bf16 %v1177_v38, %v1176_v52  ;;  %v1255_v57 = vpack.c.bf16 %v1209_v61, %v1208_v46 }
 0x1e8   :  { %v1320_v53 = vunpack.c.l.b16 %v1239_v42  ;;  %v1321_v8 = vunpack.c.h.b16 %v1239_v42  ;;  %v1474_v22 = vunpack.c.l.b16 %v1255_v57  ;;  %v1475_v31 = vunpack.c.h.b16 %v1255_v57 }
 0x1ea   :  { %v1350_v25 = vpack.c.b16 %v1320_v53, %v1318_v63  ;;  %v1351_v59 = vpack.c.b16 %v1321_v8, %v1319_v11  ;;  %v1504_v54 = vpack.c.b16 %v1474_v22, %v1472_v41  ;;  %v1505_v29 = vpack.c.b16 %v1475_v31, %v1473_v36 }
 0x1ec   :  { %1389 = vmatpush.bf16.msra.mxu0 %v1350_v25  ;;  %1418 = vmatpush.bf16.msra.mxu1 %v1351_v59 }
 0x1ed   :  { %1543 = vmatpush.bf16.msra.mxu2 %v1504_v54  ;;  %1572 = vmatpush.bf16.msra.mxu3 %v1505_v29 }
 0x1ef   :  { %1390 = vmatmul.bf16.vlgmr.msra.gmra.mxu0 %v1645_v1  ;;  %1419 = vmatmul.bf16.vlgmr.msra.gmra.mxu1 %v1645_v1 }
 0x1f0   :  { %1544 = vmatmul.bf16.vlgmr.msra.gmra.mxu2 %v1645_v1  ;;  %1573 = vmatmul.bf16.vlgmr.msra.gmra.mxu3 %v1645_v1 }
 0x1ff   :  { %1395 = vmatmul.bf16.gmra.mxu0 %v1646_v48  ;;  %1424 = vmatmul.bf16.gmra.mxu1 %v1646_v48 }
 0x200   :  { %1549 = vmatmul.bf16.gmra.mxu2 %v1646_v48  ;;  %1578 = vmatmul.bf16.gmra.mxu3 %v1646_v48 }
 0x20f   :  { %1400 = vmatmul.bf16.gmra.mxu0 %v1647_v51  ;;  %1429 = vmatmul.bf16.gmra.mxu1 %v1647_v51 }
 0x210   :  { %1554 = vmatmul.bf16.gmra.mxu2 %v1647_v51  ;;  %1583 = vmatmul.bf16.gmra.mxu3 %v1647_v51 }
 0x21f   :  { %1405 = vmatmul.bf16.gmra.mxu0 %v1648_v47  ;;  %1434 = vmatmul.bf16.gmra.mxu1 %v1648_v47 }
 0x220   :  { %1559 = vmatmul.bf16.gmra.mxu2 %v1648_v47  ;;  %1588 = vmatmul.bf16.gmra.mxu3 %v1648_v47 }
 0x26c   :  { %v1391_v20 = vpop.f32.mrf.mxu0  ;;  %v1420_v30 = vpop.f32.mrf.mxu1 }
 0x26d   :  { %1440 = vst [vmem:[#allocation2] sm:$0xff] %v1391_v20 }
 0x26e   :  { %1441 = vst.msk [vmem:[#allocation2 + $0x8] sm:$0xff] %vm149_vm0, %v1420_v30 }
 0x273   :  { %v1545_v21 = vpop.f32.mrf.mxu2  ;;  %v1574_v17 = vpop.f32.mrf.mxu3 }
 0x274   :  { %1595 = vst [vmem:[#allocation2 + $0x80] sm:$0xff] %v1545_v21  ;;  %v1393_v4 = vpop.f32.mrf.mxu0  ;;  %v1422_v58 = vpop.f32.mrf.mxu1 }
 0x275   :  { %1596 = vst.msk [vmem:[#allocation2 + $0x88] sm:$0xff] %vm149_vm0, %v1574_v17 }
 0x276   :  { %1442 = vst [vmem:[#allocation2 + $0x10] sm:$0xff] %v1393_v4 }
 0x277   :  { %1443 = vst.msk [vmem:[#allocation2 + $0x18] sm:$0xff] %vm149_vm0, %v1422_v58 }
 0x27b   :  { %v1547_v62 = vpop.f32.mrf.mxu2  ;;  %v1576_v55 = vpop.f32.mrf.mxu3 }
 0x27c   :  { %1597 = vst [vmem:[#allocation2 + $0x90] sm:$0xff] %v1547_v62  ;;  %v1396_v5 = vpop.f32.mrf.mxu0  ;;  %v1425_v16 = vpop.f32.mrf.mxu1 }
 0x27d   :  { %1598 = vst.msk [vmem:[#allocation2 + $0x98] sm:$0xff] %vm149_vm0, %v1576_v55 }
 0x27e   :  { %1444 = vst [vmem:[#allocation2 + $0x20] sm:$0xff] %v1396_v5 }
 0x27f   :  { %1445 = vst.msk [vmem:[#allocation2 + $0x28] sm:$0xff] %vm149_vm0, %v1425_v16 }
 0x283   :  { %v1550_v13 = vpop.f32.mrf.mxu2  ;;  %v1579_v3 = vpop.f32.mrf.mxu3 }
 0x284   :  { %1599 = vst [vmem:[#allocation2 + $0xa0] sm:$0xff] %v1550_v13  ;;  %v1398_v15 = vpop.f32.mrf.mxu0  ;;  %v1427_v50 = vpop.f32.mrf.mxu1 }
 0x285   :  { %1600 = vst.msk [vmem:[#allocation2 + $0xa8] sm:$0xff] %vm149_vm0, %v1579_v3 }
 0x286   :  { %1446 = vst [vmem:[#allocation2 + $0x30] sm:$0xff] %v1398_v15 }
 0x287   :  { %1447 = vst.msk [vmem:[#allocation2 + $0x38] sm:$0xff] %vm149_vm0, %v1427_v50 }
 0x28b   :  { %v1552_v56 = vpop.f32.mrf.mxu2  ;;  %v1581_v32 = vpop.f32.mrf.mxu3 }
 0x28c   :  { %1601 = vst [vmem:[#allocation2 + $0xb0] sm:$0xff] %v1552_v56  ;;  %v1401_v7 = vpop.f32.mrf.mxu0  ;;  %v1430_v60 = vpop.f32.mrf.mxu1 }
 0x28d   :  { %1602 = vst.msk [vmem:[#allocation2 + $0xb8] sm:$0xff] %vm149_vm0, %v1581_v32 }
 0x28e   :  { %1448 = vst [vmem:[#allocation2 + $0x40] sm:$0xff] %v1401_v7 }
 0x28f   :  { %1449 = vst.msk [vmem:[#allocation2 + $0x48] sm:$0xff] %vm149_vm0, %v1430_v60 }
 0x293   :  { %v1555_v12 = vpop.f32.mrf.mxu2  ;;  %v1584_v18 = vpop.f32.mrf.mxu3 }
 0x294   :  { %1603 = vst [vmem:[#allocation2 + $0xc0] sm:$0xff] %v1555_v12  ;;  %v1403_v37 = vpop.f32.mrf.mxu0  ;;  %v1432_v40 = vpop.f32.mrf.mxu1 }
 0x295   :  { %1604 = vst.msk [vmem:[#allocation2 + $0xc8] sm:$0xff] %vm149_vm0, %v1584_v18 }
 0x296   :  { %1450 = vst [vmem:[#allocation2 + $0x50] sm:$0xff] %v1403_v37 }
 0x297   :  { %1451 = vst.msk [vmem:[#allocation2 + $0x58] sm:$0xff] %vm149_vm0, %v1432_v40 }
 0x29b   :  { %v1557_v2 = vpop.f32.mrf.mxu2  ;;  %v1586_v6 = vpop.f32.mrf.mxu3 }
 0x29c   :  { %1605 = vst [vmem:[#allocation2 + $0xd0] sm:$0xff] %v1557_v2  ;;  %v1406_v0 = vpop.f32.mrf.mxu0  ;;  %v1435_v19 = vpop.f32.mrf.mxu1 }
 0x29d   :  { %1606 = vst.msk [vmem:[#allocation2 + $0xd8] sm:$0xff] %vm149_vm0, %v1586_v6 }
 0x29e   :  { %1452 = vst [vmem:[#allocation2 + $0x60] sm:$0xff] %v1406_v0 }
 0x29f   :  { %1453 = vst.msk [vmem:[#allocation2 + $0x68] sm:$0xff] %vm149_vm0, %v1435_v19 }
 0x2a3   :  { %v1560_v33 = vpop.f32.mrf.mxu2  ;;  %v1589_v26 = vpop.f32.mrf.mxu3 }
 0x2a4   :  { %1607 = vst [vmem:[#allocation2 + $0xe0] sm:$0xff] %v1560_v33  ;;  %v1408_v28 = vpop.f32.mrf.mxu0  ;;  %v1437_v14 = vpop.f32.mrf.mxu1 }
 0x2a5   :  { %1608 = vst.msk [vmem:[#allocation2 + $0xe8] sm:$0xff] %vm149_vm0, %v1589_v26 }
 0x2a6   :  { %1454 = vst [vmem:[#allocation2 + $0x70] sm:$0xff] %v1408_v28 }
 0x2a7   :  { %1455 = vst.msk [vmem:[#allocation2 + $0x78] sm:$0xff] %vm149_vm0, %v1437_v14 }
 0x2ab   :  { %v1562_v24 = vpop.f32.mrf.mxu2  ;;  %v1591_v39 = vpop.f32.mrf.mxu3 }
 0x2ac   :  { %1609 = vst [vmem:[#allocation2 + $0xf0] sm:$0xff] %v1562_v24 }
 0x2ad   :  { %1610 = vst.msk [vmem:[#allocation2 + $0xf8] sm:$0xff] %vm149_vm0, %v1591_v39 }
 0x2ae   :  { %1623 = dma.vmem_to_hbm [thread:$0]  %s1616_s27, 4096, %s1618_s30, [#allocation3], %s1716_s6, %s1716_s6, %s1717_s2  }
 0x2af   :  { %1712 = dma.done.wait [#allocation3], 4096  }
 0x2b0   :  { %1713 = vsyncadd [#allocation3], 4294963200 }
 0x2b1   :  { %1628 = vsyncpa [#allocation3], 1 }

</bundles_post_ra>
